<compile_context>
chip_gen: v6e
topology: v6e:2x2x1
jax: 0.10.0
libtpu: 0.0.40
codegen_flags: <defaults>
</compile_context>

<pallas_src>
import jax
import jax.numpy as jnp
from jax.experimental import pallas as pl
from jax.experimental.pallas import tpu as pltpu


def _rot_lanes(x, shift):
    """Cyclic rotation along the lane (gate) axis.

    jnp.roll with a static shift lowers to two static lane slices + a
    concatenate; every use below is block-symmetric, so either rotation
    direction is correct.
    """
    return jnp.roll(x, shift, axis=1)


def _lstm_kernel(x_ref, wih_t_ref, bias_ref, whh_ref, fcw_ref, fcb_ref, out_ref):
    B, T, F = x_ref.shape
    G = whh_ref.shape[0]             # 4H, lane-dense gate axis (= 128 here)
    H = G // 4

    # ---- loop-invariant loads / constants, hoisted out of the unrolled loop ----
    whh = whh_ref[...]               # (4H, 4H); only rows [H, 2H) are nonzero
    wih_t = wih_t_ref[...]           # (F, 4H) = W_ih^T
    bias_b = jnp.broadcast_to(bias_ref[...], (B, G))       # b_ih + b_hh, hoisted

    # Per-lane constants for the single-tanh activation:
    #   sigmoid(x) = 0.5*(1 + tanh(x/2))  (i/f/o lanes);  g lanes: plain tanh.
    lane = jax.lax.broadcasted_iota(jnp.int32, (B, G), 1)
    is_g = (lane >= 2 * H) & (lane < 3 * H)
    sc = jnp.where(is_g, 1.0, 0.5).astype(jnp.float32)     # pre- and post-scale
    off = jnp.where(is_g, 0.0, 0.5).astype(jnp.float32)    # post-offset

    x_all = x_ref[...]               # (B, T, F), tiny

    # h / c carries kept lane-dense as (B, 4H); the valid state lives in lanes
    # [H, 2H) (the 'f' gate's home block).  Dead lanes hold bounded garbage
    # nulled by the zero rows of whh / zero lanes of fcw -> no in-kernel slicing.
    h = jnp.zeros((B, G), jnp.float32)
    c = jnp.zeros((B, G), jnp.float32)

    # T is small & static -> full unroll inside one kernel invocation.
    for t in range(T):
        # Input projection for this step (no serial dependence): F is tiny, so
        # a few broadcast FMAs on the VPU instead of a small-K MXU matmul.
        x_t = x_all[:, t, :]                                # (B, F)
        gx = bias_b
        for f in range(F):
            gx = gx + x_t[:, f:f + 1] * wih_t[f:f + 1, :]   # (B,1)*(1,4H)

        # Only this matmul is on the serial h -> gates chain.
        gates = gx + jnp.dot(h, whh, preferred_element_type=jnp.float32)

        # One EUP pass: tanh for the g lanes, tanh-expressed sigmoid elsewhere.
        # Gate lane order is PyTorch's [ i | f | g | o ].
        act = jnp.tanh(gates * sc) * sc + off

        # Three mutually independent lane rotations (all depend only on `act`):
        #   rot(act, H) * rot(act, 3H) puts i*g in lanes [H, 2H),
        #   rot(act, 2H)               puts  o  in lanes [H, 2H),
        # for either rotation direction (block-symmetric products).
        ig = _rot_lanes(act, H) * _rot_lanes(act, 3 * H)
        r2 = _rot_lanes(act, 2 * H)

        c = act * c + ig             # lanes [H, 2H): f*c + i*g
        h = r2 * jnp.tanh(c)         # lanes [H, 2H): o*tanh(c)

    # Fused final FC: VPU multiply + lane reduction (fcw is zero outside
    # lanes [H, 2H)); no 1-column MXU pass.
    out_ref[...] = (jnp.sum(h * fcw_ref[...], axis=-1, keepdims=True)
                    + fcb_ref[...]).astype(out_ref.dtype)


def prepare_lstm_params(w_ih, w_hh, b_ih, b_hh, fc_w, fc_b):
    """One-time weight prep (transpose / pad / bias combine) -> kernel operands.

    Done once so the per-call forward issues no wrapper-side XLA ops.
    """
    f32 = jnp.float32
    G, F = w_ih.shape                # G = 4H
    H = w_hh.shape[1]
    assert G == 4 * H

    wih_t = jnp.asarray(w_ih, f32).T                                   # (F, 4H)
    bias = (jnp.asarray(b_ih, f32) + jnp.asarray(b_hh, f32)).reshape(1, G)
    # W_hh^T embedded at rows [H, 2H) of a (4H, 4H) matrix: the h carry lives in
    # that lane block and the zero rows null its dead lanes.
    whh_pad = jnp.zeros((G, G), f32).at[H:2 * H, :].set(jnp.asarray(w_hh, f32).T)
    fcw_pad = jnp.zeros((1, G), f32).at[0, H:2 * H].set(
        jnp.asarray(fc_w, f32).reshape(H))
    fcb = jnp.asarray(fc_b, f32).reshape(1, 1)
    return wih_t, bias, whh_pad, fcw_pad, fcb


def lstm_baseline_forward(x_btf, params):
    """x_btf: (B, T, F) batch_first, like the PyTorch module.  Returns (B, 1)."""
    wih_t, bias, whh_pad, fcw_pad, fcb = params
    B, T, F = x_btf.shape
    G = whh_pad.shape[0]

    flops = T * (2 * B * G * G + 2 * B * F * G + 12 * B * G) + 2 * B * G
    transcendentals = 2 * T * B * G
    bytes_accessed = 4 * (B * T * F + F * G + G + G * G + G + 1 + B)

    return pl.pallas_call(
        _lstm_kernel,
        out_shape=jax.ShapeDtypeStruct((B, 1), jnp.float32),
        in_specs=[pl.BlockSpec(memory_space=pltpu.MemorySpace.VMEM)] * 6,
        out_specs=pl.BlockSpec(memory_space=pltpu.MemorySpace.VMEM),
        cost_estimate=pl.CostEstimate(
            flops=flops,
            transcendentals=transcendentals,
            bytes_accessed=bytes_accessed),
    )(x_btf.astype(jnp.float32), wih_t, bias, whh_pad, fcw_pad, fcb)


def _reference_forward(x_btf, w_ih, w_hh, b_ih, b_hh, fc_w, fc_b):
    """Pure-JAX reference mirroring torch.nn.LSTM (1 layer) + nn.Linear."""
    B, T, F = x_btf.shape
    H = w_hh.shape[1]

    def step(carry, x_t):
        h, c = carry
        gates = x_t @ w_ih.T + h @ w_hh.T + b_ih + b_hh
        i = jax.nn.sigmoid(gates[:, 0 * H:1 * H])
        f = jax.nn.sigmoid(gates[:, 1 * H:2 * H])
        g = jnp.tanh(gates[:, 2 * H:3 * H])
        o = jax.nn.sigmoid(gates[:, 3 * H:4 * H])
        c = f * c + i * g
        h = o * jnp.tanh(c)
        return (h, c), None

    h0 = jnp.zeros((B, H), jnp.float32)
    c0 = jnp.zeros((B, H), jnp.float32)
    (h_last, _), _ = jax.lax.scan(step, (h0, c0),
                                  jnp.transpose(x_btf, (1, 0, 2)))
    return h_last @ fc_w.T + fc_b


if __name__ == "__main__":
    # Small shapes consistent with the module: batch=2, seq=8, feature=4, hidden=32
    B, T, F, H = 2, 8, 4, 32

    key = jax.random.PRNGKey(0)
    ks = jax.random.split(key, 7)
    bound = 1.0 / jnp.sqrt(H)   # PyTorch default init: uniform(-1/sqrt(H), 1/sqrt(H))

    x = jax.random.normal(ks[0], (B, T, F), jnp.float32)
    w_ih = jax.random.uniform(ks[1], (4 * H, F), jnp.float32, -bound, bound)
    w_hh = jax.random.uniform(ks[2], (4 * H, H), jnp.float32, -bound, bound)
    b_ih = jax.random.uniform(ks[3], (4 * H,), jnp.float32, -bound, bound)
    b_hh = jax.random.uniform(ks[4], (4 * H,), jnp.float32, -bound, bound)
    fc_w = jax.random.uniform(ks[5], (1, H), jnp.float32, -bound, bound)
    fc_b = jax.random.uniform(ks[6], (1,), jnp.float32, -bound, bound)

    params = prepare_lstm_params(w_ih, w_hh, b_ih, b_hh, fc_w, fc_b)
    pred = lstm_baseline_forward(x, params)
    pred = jax.block_until_ready(pred)

    ref = _reference_forward(x, w_ih, w_hh, b_ih, b_hh, fc_w, fc_b)
    assert pred.shape == (B, 1)
    assert jnp.allclose(pred, ref, atol=1e-4, rtol=1e-4), (pred, ref)

    print("KERNEL_OK")
</pallas_src>

<mosaic_0001>
module attributes {stable_mosaic.version = 11 : i64} {
  func.func @_lstm_kernel(%arg0: memref<2x8x4xf32, #tpu.memory_space<vmem>>, %arg1: memref<4x128xf32, #tpu.memory_space<vmem>>, %arg2: memref<1x128xf32, #tpu.memory_space<vmem>>, %arg3: memref<128x128xf32, #tpu.memory_space<vmem>>, %arg4: memref<1x128xf32, #tpu.memory_space<vmem>>, %arg5: memref<1x1xf32, #tpu.memory_space<vmem>>, %arg6: memref<2x1xf32, #tpu.memory_space<vmem>>) attributes {dimension_semantics = [], scalar_prefetch = 0 : i64, scratch_operands = 0 : i64, tpu.core_type = #tpu.core_type<tc>} {
    %c0 = arith.constant 0 : index
    %c0_0 = arith.constant 0 : index
    %0 = vector.load %arg3[%c0, %c0_0] : memref<128x128xf32, #tpu.memory_space<vmem>>, vector<128x128xf32>
    %c0_1 = arith.constant 0 : index
    %c0_2 = arith.constant 0 : index
    %1 = vector.load %arg1[%c0_1, %c0_2] : memref<4x128xf32, #tpu.memory_space<vmem>>, vector<4x128xf32>
    %c0_3 = arith.constant 0 : index
    %c0_4 = arith.constant 0 : index
    %2 = vector.load %arg2[%c0_3, %c0_4] : memref<1x128xf32, #tpu.memory_space<vmem>>, vector<1x128xf32>
    %3 = vector.shape_cast %2 : vector<1x128xf32> to vector<1x128xf32>
    %4 = vector.broadcast %3 : vector<1x128xf32> to vector<2x128xf32>
    %5 = tpu.iota {dimensions = array<i32: 1>} : vector<2x128xi32>
    %c64_i32 = arith.constant 64 : i32
    %6 = vector.broadcast %c64_i32 : i32 to vector<2x128xi32>
    %7 = arith.cmpi sge, %5, %6 : vector<2x128xi32>
    %c96_i32 = arith.constant 96 : i32
    %8 = vector.broadcast %c96_i32 : i32 to vector<2x128xi32>
    %9 = arith.cmpi slt, %5, %8 : vector<2x128xi32>
    %10 = arith.andi %7, %9 : vector<2x128xi1>
    %cst = arith.constant 1.000000e+00 : f32
    %cst_5 = arith.constant 5.000000e-01 : f32
    %11 = vector.broadcast %cst : f32 to vector<2x128xf32>
    %12 = vector.broadcast %cst_5 : f32 to vector<2x128xf32>
    %13 = arith.select %10, %11, %12 : vector<2x128xi1>, vector<2x128xf32>
    %cst_6 = arith.constant 0.000000e+00 : f32
    %cst_7 = arith.constant 5.000000e-01 : f32
    %14 = vector.broadcast %cst_6 : f32 to vector<2x128xf32>
    %15 = vector.broadcast %cst_7 : f32 to vector<2x128xf32>
    %16 = arith.select %10, %14, %15 : vector<2x128xi1>, vector<2x128xf32>
    %c0_8 = arith.constant 0 : index
    %c0_9 = arith.constant 0 : index
    %c0_10 = arith.constant 0 : index
    %17 = vector.load %arg0[%c0_8, %c0_9, %c0_10] : memref<2x8x4xf32, #tpu.memory_space<vmem>>, vector<2x8x4xf32>
    %cst_11 = arith.constant 0.000000e+00 : f32
    %18 = vector.broadcast %cst_11 : f32 to vector<2x128xf32>
    %cst_12 = arith.constant 0.000000e+00 : f32
    %19 = vector.broadcast %cst_12 : f32 to vector<2x128xf32>
    %20 = vector.extract_strided_slice %17 {offsets = [0, 0, 0], sizes = [2, 1, 4], strides = [1, 1, 1]} : vector<2x8x4xf32> to vector<2x1x4xf32>
    %21 = vector.shape_cast %20 : vector<2x1x4xf32> to vector<2x4xf32>
    %22 = vector.extract_strided_slice %21 {offsets = [0, 0], sizes = [2, 1], strides = [1, 1]} : vector<2x4xf32> to vector<2x1xf32>
    %23 = vector.extract_strided_slice %1 {offsets = [0, 0], sizes = [1, 128], strides = [1, 1]} : vector<4x128xf32> to vector<1x128xf32>
    %24 = vector.broadcast %22 : vector<2x1xf32> to vector<2x128xf32>
    %25 = vector.broadcast %23 : vector<1x128xf32> to vector<2x128xf32>
    %26 = arith.mulf %24, %25 : vector<2x128xf32>
    %27 = arith.addf %4, %26 : vector<2x128xf32>
    %28 = vector.extract_strided_slice %21 {offsets = [0, 1], sizes = [2, 1], strides = [1, 1]} : vector<2x4xf32> to vector<2x1xf32>
    %29 = vector.extract_strided_slice %1 {offsets = [1, 0], sizes = [1, 128], strides = [1, 1]} : vector<4x128xf32> to vector<1x128xf32>
    %30 = vector.broadcast %28 : vector<2x1xf32> to vector<2x128xf32>
    %31 = vector.broadcast %29 : vector<1x128xf32> to vector<2x128xf32>
    %32 = arith.mulf %30, %31 : vector<2x128xf32>
    %33 = arith.addf %27, %32 : vector<2x128xf32>
    %34 = vector.extract_strided_slice %21 {offsets = [0, 2], sizes = [2, 1], strides = [1, 1]} : vector<2x4xf32> to vector<2x1xf32>
    %35 = vector.extract_strided_slice %1 {offsets = [2, 0], sizes = [1, 128], strides = [1, 1]} : vector<4x128xf32> to vector<1x128xf32>
    %36 = vector.broadcast %34 : vector<2x1xf32> to vector<2x128xf32>
    %37 = vector.broadcast %35 : vector<1x128xf32> to vector<2x128xf32>
    %38 = arith.mulf %36, %37 : vector<2x128xf32>
    %39 = arith.addf %33, %38 : vector<2x128xf32>
    %40 = vector.extract_strided_slice %21 {offsets = [0, 3], sizes = [2, 1], strides = [1, 1]} : vector<2x4xf32> to vector<2x1xf32>
    %41 = vector.extract_strided_slice %1 {offsets = [3, 0], sizes = [1, 128], strides = [1, 1]} : vector<4x128xf32> to vector<1x128xf32>
    %42 = vector.broadcast %40 : vector<2x1xf32> to vector<2x128xf32>
    %43 = vector.broadcast %41 : vector<1x128xf32> to vector<2x128xf32>
    %44 = arith.mulf %42, %43 : vector<2x128xf32>
    %45 = arith.addf %39, %44 : vector<2x128xf32>
    %cst_13 = arith.constant dense<0.000000e+00> : vector<2x128xf32>
    %46 = tpu.matmul %18, %0, %cst_13 {dimension_numbers = #tpu.dot_dimension_numbers<[1], [0], [0], [1], [0, 0, 1, 1], [], []>} : vector<2x128xf32>, vector<128x128xf32>, vector<2x128xf32> -> vector<2x128xf32>
    %47 = arith.addf %45, %46 : vector<2x128xf32>
    %48 = arith.mulf %47, %13 : vector<2x128xf32>
    %49 = math.tanh %48 : vector<2x128xf32>
    %50 = arith.mulf %49, %13 : vector<2x128xf32>
    %51 = arith.addf %50, %16 : vector<2x128xf32>
    %52 = vector.extract_strided_slice %51 {offsets = [0, 96], sizes = [2, 32], strides = [1, 1]} : vector<2x128xf32> to vector<2x32xf32>
    %53 = vector.extract_strided_slice %51 {offsets = [0, 0], sizes = [2, 96], strides = [1, 1]} : vector<2x128xf32> to vector<2x96xf32>
    %54 = tpu.concatenate %52, %53 in 1 : vector<2x32xf32>, vector<2x96xf32> -> vector<2x128xf32>
    %55 = vector.extract_strided_slice %51 {offsets = [0, 32], sizes = [2, 96], strides = [1, 1]} : vector<2x128xf32> to vector<2x96xf32>
    %56 = vector.extract_strided_slice %51 {offsets = [0, 0], sizes = [2, 32], strides = [1, 1]} : vector<2x128xf32> to vector<2x32xf32>
    %57 = tpu.concatenate %55, %56 in 1 : vector<2x96xf32>, vector<2x32xf32> -> vector<2x128xf32>
    %58 = arith.mulf %54, %57 : vector<2x128xf32>
    %59 = vector.extract_strided_slice %51 {offsets = [0, 64], sizes = [2, 64], strides = [1, 1]} : vector<2x128xf32> to vector<2x64xf32>
    %60 = vector.extract_strided_slice %51 {offsets = [0, 0], sizes = [2, 64], strides = [1, 1]} : vector<2x128xf32> to vector<2x64xf32>
    %61 = tpu.concatenate %59, %60 in 1 : vector<2x64xf32>, vector<2x64xf32> -> vector<2x128xf32>
    %62 = arith.mulf %51, %19 : vector<2x128xf32>
    %63 = arith.addf %62, %58 : vector<2x128xf32>
    %64 = math.tanh %63 : vector<2x128xf32>
    %65 = arith.mulf %61, %64 : vector<2x128xf32>
    %66 = vector.extract_strided_slice %17 {offsets = [0, 1, 0], sizes = [2, 1, 4], strides = [1, 1, 1]} : vector<2x8x4xf32> to vector<2x1x4xf32>
    %67 = vector.shape_cast %66 : vector<2x1x4xf32> to vector<2x4xf32>
    %68 = vector.extract_strided_slice %67 {offsets = [0, 0], sizes = [2, 1], strides = [1, 1]} : vector<2x4xf32> to vector<2x1xf32>
    %69 = vector.extract_strided_slice %1 {offsets = [0, 0], sizes = [1, 128], strides = [1, 1]} : vector<4x128xf32> to vector<1x128xf32>
    %70 = vector.broadcast %68 : vector<2x1xf32> to vector<2x128xf32>
    %71 = vector.broadcast %69 : vector<1x128xf32> to vector<2x128xf32>
    %72 = arith.mulf %70, %71 : vector<2x128xf32>
    %73 = arith.addf %4, %72 : vector<2x128xf32>
    %74 = vector.extract_strided_slice %67 {offsets = [0, 1], sizes = [2, 1], strides = [1, 1]} : vector<2x4xf32> to vector<2x1xf32>
    %75 = vector.extract_strided_slice %1 {offsets = [1, 0], sizes = [1, 128], strides = [1, 1]} : vector<4x128xf32> to vector<1x128xf32>
    %76 = vector.broadcast %74 : vector<2x1xf32> to vector<2x128xf32>
    %77 = vector.broadcast %75 : vector<1x128xf32> to vector<2x128xf32>
    %78 = arith.mulf %76, %77 : vector<2x128xf32>
    %79 = arith.addf %73, %78 : vector<2x128xf32>
    %80 = vector.extract_strided_slice %67 {offsets = [0, 2], sizes = [2, 1], strides = [1, 1]} : vector<2x4xf32> to vector<2x1xf32>
    %81 = vector.extract_strided_slice %1 {offsets = [2, 0], sizes = [1, 128], strides = [1, 1]} : vector<4x128xf32> to vector<1x128xf32>
    %82 = vector.broadcast %80 : vector<2x1xf32> to vector<2x128xf32>
    %83 = vector.broadcast %81 : vector<1x128xf32> to vector<2x128xf32>
    %84 = arith.mulf %82, %83 : vector<2x128xf32>
    %85 = arith.addf %79, %84 : vector<2x128xf32>
    %86 = vector.extract_strided_slice %67 {offsets = [0, 3], sizes = [2, 1], strides = [1, 1]} : vector<2x4xf32> to vector<2x1xf32>
    %87 = vector.extract_strided_slice %1 {offsets = [3, 0], sizes = [1, 128], strides = [1, 1]} : vector<4x128xf32> to vector<1x128xf32>
    %88 = vector.broadcast %86 : vector<2x1xf32> to vector<2x128xf32>
    %89 = vector.broadcast %87 : vector<1x128xf32> to vector<2x128xf32>
    %90 = arith.mulf %88, %89 : vector<2x128xf32>
    %91 = arith.addf %85, %90 : vector<2x128xf32>
    %cst_14 = arith.constant dense<0.000000e+00> : vector<2x128xf32>
    %92 = tpu.matmul %65, %0, %cst_14 {dimension_numbers = #tpu.dot_dimension_numbers<[1], [0], [0], [1], [0, 0, 1, 1], [], []>} : vector<2x128xf32>, vector<128x128xf32>, vector<2x128xf32> -> vector<2x128xf32>
    %93 = arith.addf %91, %92 : vector<2x128xf32>
    %94 = arith.mulf %93, %13 : vector<2x128xf32>
    %95 = math.tanh %94 : vector<2x128xf32>
    %96 = arith.mulf %95, %13 : vector<2x128xf32>
    %97 = arith.addf %96, %16 : vector<2x128xf32>
    %98 = vector.extract_strided_slice %97 {offsets = [0, 96], sizes = [2, 32], strides = [1, 1]} : vector<2x128xf32> to vector<2x32xf32>
    %99 = vector.extract_strided_slice %97 {offsets = [0, 0], sizes = [2, 96], strides = [1, 1]} : vector<2x128xf32> to vector<2x96xf32>
    %100 = tpu.concatenate %98, %99 in 1 : vector<2x32xf32>, vector<2x96xf32> -> vector<2x128xf32>
    %101 = vector.extract_strided_slice %97 {offsets = [0, 32], sizes = [2, 96], strides = [1, 1]} : vector<2x128xf32> to vector<2x96xf32>
    %102 = vector.extract_strided_slice %97 {offsets = [0, 0], sizes = [2, 32], strides = [1, 1]} : vector<2x128xf32> to vector<2x32xf32>
    %103 = tpu.concatenate %101, %102 in 1 : vector<2x96xf32>, vector<2x32xf32> -> vector<2x128xf32>
    %104 = arith.mulf %100, %103 : vector<2x128xf32>
    %105 = vector.extract_strided_slice %97 {offsets = [0, 64], sizes = [2, 64], strides = [1, 1]} : vector<2x128xf32> to vector<2x64xf32>
    %106 = vector.extract_strided_slice %97 {offsets = [0, 0], sizes = [2, 64], strides = [1, 1]} : vector<2x128xf32> to vector<2x64xf32>
    %107 = tpu.concatenate %105, %106 in 1 : vector<2x64xf32>, vector<2x64xf32> -> vector<2x128xf32>
    %108 = arith.mulf %97, %63 : vector<2x128xf32>
    %109 = arith.addf %108, %104 : vector<2x128xf32>
    %110 = math.tanh %109 : vector<2x128xf32>
    %111 = arith.mulf %107, %110 : vector<2x128xf32>
    %112 = vector.extract_strided_slice %17 {offsets = [0, 2, 0], sizes = [2, 1, 4], strides = [1, 1, 1]} : vector<2x8x4xf32> to vector<2x1x4xf32>
    %113 = vector.shape_cast %112 : vector<2x1x4xf32> to vector<2x4xf32>
    %114 = vector.extract_strided_slice %113 {offsets = [0, 0], sizes = [2, 1], strides = [1, 1]} : vector<2x4xf32> to vector<2x1xf32>
    %115 = vector.extract_strided_slice %1 {offsets = [0, 0], sizes = [1, 128], strides = [1, 1]} : vector<4x128xf32> to vector<1x128xf32>
    %116 = vector.broadcast %114 : vector<2x1xf32> to vector<2x128xf32>
    %117 = vector.broadcast %115 : vector<1x128xf32> to vector<2x128xf32>
    %118 = arith.mulf %116, %117 : vector<2x128xf32>
    %119 = arith.addf %4, %118 : vector<2x128xf32>
    %120 = vector.extract_strided_slice %113 {offsets = [0, 1], sizes = [2, 1], strides = [1, 1]} : vector<2x4xf32> to vector<2x1xf32>
    %121 = vector.extract_strided_slice %1 {offsets = [1, 0], sizes = [1, 128], strides = [1, 1]} : vector<4x128xf32> to vector<1x128xf32>
    %122 = vector.broadcast %120 : vector<2x1xf32> to vector<2x128xf32>
    %123 = vector.broadcast %121 : vector<1x128xf32> to vector<2x128xf32>
    %124 = arith.mulf %122, %123 : vector<2x128xf32>
    %125 = arith.addf %119, %124 : vector<2x128xf32>
    %126 = vector.extract_strided_slice %113 {offsets = [0, 2], sizes = [2, 1], strides = [1, 1]} : vector<2x4xf32> to vector<2x1xf32>
    %127 = vector.extract_strided_slice %1 {offsets = [2, 0], sizes = [1, 128], strides = [1, 1]} : vector<4x128xf32> to vector<1x128xf32>
    %128 = vector.broadcast %126 : vector<2x1xf32> to vector<2x128xf32>
    %129 = vector.broadcast %127 : vector<1x128xf32> to vector<2x128xf32>
    %130 = arith.mulf %128, %129 : vector<2x128xf32>
    %131 = arith.addf %125, %130 : vector<2x128xf32>
    %132 = vector.extract_strided_slice %113 {offsets = [0, 3], sizes = [2, 1], strides = [1, 1]} : vector<2x4xf32> to vector<2x1xf32>
    %133 = vector.extract_strided_slice %1 {offsets = [3, 0], sizes = [1, 128], strides = [1, 1]} : vector<4x128xf32> to vector<1x128xf32>
    %134 = vector.broadcast %132 : vector<2x1xf32> to vector<2x128xf32>
    %135 = vector.broadcast %133 : vector<1x128xf32> to vector<2x128xf32>
    %136 = arith.mulf %134, %135 : vector<2x128xf32>
    %137 = arith.addf %131, %136 : vector<2x128xf32>
    %cst_15 = arith.constant dense<0.000000e+00> : vector<2x128xf32>
    %138 = tpu.matmul %111, %0, %cst_15 {dimension_numbers = #tpu.dot_dimension_numbers<[1], [0], [0], [1], [0, 0, 1, 1], [], []>} : vector<2x128xf32>, vector<128x128xf32>, vector<2x128xf32> -> vector<2x128xf32>
    %139 = arith.addf %137, %138 : vector<2x128xf32>
    %140 = arith.mulf %139, %13 : vector<2x128xf32>
    %141 = math.tanh %140 : vector<2x128xf32>
    %142 = arith.mulf %141, %13 : vector<2x128xf32>
    %143 = arith.addf %142, %16 : vector<2x128xf32>
    %144 = vector.extract_strided_slice %143 {offsets = [0, 96], sizes = [2, 32], strides = [1, 1]} : vector<2x128xf32> to vector<2x32xf32>
    %145 = vector.extract_strided_slice %143 {offsets = [0, 0], sizes = [2, 96], strides = [1, 1]} : vector<2x128xf32> to vector<2x96xf32>
    %146 = tpu.concatenate %144, %145 in 1 : vector<2x32xf32>, vector<2x96xf32> -> vector<2x128xf32>
    %147 = vector.extract_strided_slice %143 {offsets = [0, 32], sizes = [2, 96], strides = [1, 1]} : vector<2x128xf32> to vector<2x96xf32>
    %148 = vector.extract_strided_slice %143 {offsets = [0, 0], sizes = [2, 32], strides = [1, 1]} : vector<2x128xf32> to vector<2x32xf32>
    %149 = tpu.concatenate %147, %148 in 1 : vector<2x96xf32>, vector<2x32xf32> -> vector<2x128xf32>
    %150 = arith.mulf %146, %149 : vector<2x128xf32>
    %151 = vector.extract_strided_slice %143 {offsets = [0, 64], sizes = [2, 64], strides = [1, 1]} : vector<2x128xf32> to vector<2x64xf32>
    %152 = vector.extract_strided_slice %143 {offsets = [0, 0], sizes = [2, 64], strides = [1, 1]} : vector<2x128xf32> to vector<2x64xf32>
    %153 = tpu.concatenate %151, %152 in 1 : vector<2x64xf32>, vector<2x64xf32> -> vector<2x128xf32>
    %154 = arith.mulf %143, %109 : vector<2x128xf32>
    %155 = arith.addf %154, %150 : vector<2x128xf32>
    %156 = math.tanh %155 : vector<2x128xf32>
    %157 = arith.mulf %153, %156 : vector<2x128xf32>
    %158 = vector.extract_strided_slice %17 {offsets = [0, 3, 0], sizes = [2, 1, 4], strides = [1, 1, 1]} : vector<2x8x4xf32> to vector<2x1x4xf32>
    %159 = vector.shape_cast %158 : vector<2x1x4xf32> to vector<2x4xf32>
    %160 = vector.extract_strided_slice %159 {offsets = [0, 0], sizes = [2, 1], strides = [1, 1]} : vector<2x4xf32> to vector<2x1xf32>
    %161 = vector.extract_strided_slice %1 {offsets = [0, 0], sizes = [1, 128], strides = [1, 1]} : vector<4x128xf32> to vector<1x128xf32>
    %162 = vector.broadcast %160 : vector<2x1xf32> to vector<2x128xf32>
    %163 = vector.broadcast %161 : vector<1x128xf32> to vector<2x128xf32>
    %164 = arith.mulf %162, %163 : vector<2x128xf32>
    %165 = arith.addf %4, %164 : vector<2x128xf32>
    %166 = vector.extract_strided_slice %159 {offsets = [0, 1], sizes = [2, 1], strides = [1, 1]} : vector<2x4xf32> to vector<2x1xf32>
    %167 = vector.extract_strided_slice %1 {offsets = [1, 0], sizes = [1, 128], strides = [1, 1]} : vector<4x128xf32> to vector<1x128xf32>
    %168 = vector.broadcast %166 : vector<2x1xf32> to vector<2x128xf32>
    %169 = vector.broadcast %167 : vector<1x128xf32> to vector<2x128xf32>
    %170 = arith.mulf %168, %169 : vector<2x128xf32>
    %171 = arith.addf %165, %170 : vector<2x128xf32>
    %172 = vector.extract_strided_slice %159 {offsets = [0, 2], sizes = [2, 1], strides = [1, 1]} : vector<2x4xf32> to vector<2x1xf32>
    %173 = vector.extract_strided_slice %1 {offsets = [2, 0], sizes = [1, 128], strides = [1, 1]} : vector<4x128xf32> to vector<1x128xf32>
    %174 = vector.broadcast %172 : vector<2x1xf32> to vector<2x128xf32>
    %175 = vector.broadcast %173 : vector<1x128xf32> to vector<2x128xf32>
    %176 = arith.mulf %174, %175 : vector<2x128xf32>
    %177 = arith.addf %171, %176 : vector<2x128xf32>
    %178 = vector.extract_strided_slice %159 {offsets = [0, 3], sizes = [2, 1], strides = [1, 1]} : vector<2x4xf32> to vector<2x1xf32>
    %179 = vector.extract_strided_slice %1 {offsets = [3, 0], sizes = [1, 128], strides = [1, 1]} : vector<4x128xf32> to vector<1x128xf32>
    %180 = vector.broadcast %178 : vector<2x1xf32> to vector<2x128xf32>
    %181 = vector.broadcast %179 : vector<1x128xf32> to vector<2x128xf32>
    %182 = arith.mulf %180, %181 : vector<2x128xf32>
    %183 = arith.addf %177, %182 : vector<2x128xf32>
    %cst_16 = arith.constant dense<0.000000e+00> : vector<2x128xf32>
    %184 = tpu.matmul %157, %0, %cst_16 {dimension_numbers = #tpu.dot_dimension_numbers<[1], [0], [0], [1], [0, 0, 1, 1], [], []>} : vector<2x128xf32>, vector<128x128xf32>, vector<2x128xf32> -> vector<2x128xf32>
    %185 = arith.addf %183, %184 : vector<2x128xf32>
    %186 = arith.mulf %185, %13 : vector<2x128xf32>
    %187 = math.tanh %186 : vector<2x128xf32>
    %188 = arith.mulf %187, %13 : vector<2x128xf32>
    %189 = arith.addf %188, %16 : vector<2x128xf32>
    %190 = vector.extract_strided_slice %189 {offsets = [0, 96], sizes = [2, 32], strides = [1, 1]} : vector<2x128xf32> to vector<2x32xf32>
    %191 = vector.extract_strided_slice %189 {offsets = [0, 0], sizes = [2, 96], strides = [1, 1]} : vector<2x128xf32> to vector<2x96xf32>
    %192 = tpu.concatenate %190, %191 in 1 : vector<2x32xf32>, vector<2x96xf32> -> vector<2x128xf32>
    %193 = vector.extract_strided_slice %189 {offsets = [0, 32], sizes = [2, 96], strides = [1, 1]} : vector<2x128xf32> to vector<2x96xf32>
    %194 = vector.extract_strided_slice %189 {offsets = [0, 0], sizes = [2, 32], strides = [1, 1]} : vector<2x128xf32> to vector<2x32xf32>
    %195 = tpu.concatenate %193, %194 in 1 : vector<2x96xf32>, vector<2x32xf32> -> vector<2x128xf32>
    %196 = arith.mulf %192, %195 : vector<2x128xf32>
    %197 = vector.extract_strided_slice %189 {offsets = [0, 64], sizes = [2, 64], strides = [1, 1]} : vector<2x128xf32> to vector<2x64xf32>
    %198 = vector.extract_strided_slice %189 {offsets = [0, 0], sizes = [2, 64], strides = [1, 1]} : vector<2x128xf32> to vector<2x64xf32>
    %199 = tpu.concatenate %197, %198 in 1 : vector<2x64xf32>, vector<2x64xf32> -> vector<2x128xf32>
    %200 = arith.mulf %189, %155 : vector<2x128xf32>
    %201 = arith.addf %200, %196 : vector<2x128xf32>
    %202 = math.tanh %201 : vector<2x128xf32>
    %203 = arith.mulf %199, %202 : vector<2x128xf32>
    %204 = vector.extract_strided_slice %17 {offsets = [0, 4, 0], sizes = [2, 1, 4], strides = [1, 1, 1]} : vector<2x8x4xf32> to vector<2x1x4xf32>
    %205 = vector.shape_cast %204 : vector<2x1x4xf32> to vector<2x4xf32>
    %206 = vector.extract_strided_slice %205 {offsets = [0, 0], sizes = [2, 1], strides = [1, 1]} : vector<2x4xf32> to vector<2x1xf32>
    %207 = vector.extract_strided_slice %1 {offsets = [0, 0], sizes = [1, 128], strides = [1, 1]} : vector<4x128xf32> to vector<1x128xf32>
    %208 = vector.broadcast %206 : vector<2x1xf32> to vector<2x128xf32>
    %209 = vector.broadcast %207 : vector<1x128xf32> to vector<2x128xf32>
    %210 = arith.mulf %208, %209 : vector<2x128xf32>
    %211 = arith.addf %4, %210 : vector<2x128xf32>
    %212 = vector.extract_strided_slice %205 {offsets = [0, 1], sizes = [2, 1], strides = [1, 1]} : vector<2x4xf32> to vector<2x1xf32>
    %213 = vector.extract_strided_slice %1 {offsets = [1, 0], sizes = [1, 128], strides = [1, 1]} : vector<4x128xf32> to vector<1x128xf32>
    %214 = vector.broadcast %212 : vector<2x1xf32> to vector<2x128xf32>
    %215 = vector.broadcast %213 : vector<1x128xf32> to vector<2x128xf32>
    %216 = arith.mulf %214, %215 : vector<2x128xf32>
    %217 = arith.addf %211, %216 : vector<2x128xf32>
    %218 = vector.extract_strided_slice %205 {offsets = [0, 2], sizes = [2, 1], strides = [1, 1]} : vector<2x4xf32> to vector<2x1xf32>
    %219 = vector.extract_strided_slice %1 {offsets = [2, 0], sizes = [1, 128], strides = [1, 1]} : vector<4x128xf32> to vector<1x128xf32>
    %220 = vector.broadcast %218 : vector<2x1xf32> to vector<2x128xf32>
    %221 = vector.broadcast %219 : vector<1x128xf32> to vector<2x128xf32>
    %222 = arith.mulf %220, %221 : vector<2x128xf32>
    %223 = arith.addf %217, %222 : vector<2x128xf32>
    %224 = vector.extract_strided_slice %205 {offsets = [0, 3], sizes = [2, 1], strides = [1, 1]} : vector<2x4xf32> to vector<2x1xf32>
    %225 = vector.extract_strided_slice %1 {offsets = [3, 0], sizes = [1, 128], strides = [1, 1]} : vector<4x128xf32> to vector<1x128xf32>
    %226 = vector.broadcast %224 : vector<2x1xf32> to vector<2x128xf32>
    %227 = vector.broadcast %225 : vector<1x128xf32> to vector<2x128xf32>
    %228 = arith.mulf %226, %227 : vector<2x128xf32>
    %229 = arith.addf %223, %228 : vector<2x128xf32>
    %cst_17 = arith.constant dense<0.000000e+00> : vector<2x128xf32>
    %230 = tpu.matmul %203, %0, %cst_17 {dimension_numbers = #tpu.dot_dimension_numbers<[1], [0], [0], [1], [0, 0, 1, 1], [], []>} : vector<2x128xf32>, vector<128x128xf32>, vector<2x128xf32> -> vector<2x128xf32>
    %231 = arith.addf %229, %230 : vector<2x128xf32>
    %232 = arith.mulf %231, %13 : vector<2x128xf32>
    %233 = math.tanh %232 : vector<2x128xf32>
    %234 = arith.mulf %233, %13 : vector<2x128xf32>
    %235 = arith.addf %234, %16 : vector<2x128xf32>
    %236 = vector.extract_strided_slice %235 {offsets = [0, 96], sizes = [2, 32], strides = [1, 1]} : vector<2x128xf32> to vector<2x32xf32>
    %237 = vector.extract_strided_slice %235 {offsets = [0, 0], sizes = [2, 96], strides = [1, 1]} : vector<2x128xf32> to vector<2x96xf32>
    %238 = tpu.concatenate %236, %237 in 1 : vector<2x32xf32>, vector<2x96xf32> -> vector<2x128xf32>
    %239 = vector.extract_strided_slice %235 {offsets = [0, 32], sizes = [2, 96], strides = [1, 1]} : vector<2x128xf32> to vector<2x96xf32>
    %240 = vector.extract_strided_slice %235 {offsets = [0, 0], sizes = [2, 32], strides = [1, 1]} : vector<2x128xf32> to vector<2x32xf32>
    %241 = tpu.concatenate %239, %240 in 1 : vector<2x96xf32>, vector<2x32xf32> -> vector<2x128xf32>
    %242 = arith.mulf %238, %241 : vector<2x128xf32>
    %243 = vector.extract_strided_slice %235 {offsets = [0, 64], sizes = [2, 64], strides = [1, 1]} : vector<2x128xf32> to vector<2x64xf32>
    %244 = vector.extract_strided_slice %235 {offsets = [0, 0], sizes = [2, 64], strides = [1, 1]} : vector<2x128xf32> to vector<2x64xf32>
    %245 = tpu.concatenate %243, %244 in 1 : vector<2x64xf32>, vector<2x64xf32> -> vector<2x128xf32>
    %246 = arith.mulf %235, %201 : vector<2x128xf32>
    %247 = arith.addf %246, %242 : vector<2x128xf32>
    %248 = math.tanh %247 : vector<2x128xf32>
    %249 = arith.mulf %245, %248 : vector<2x128xf32>
    %250 = vector.extract_strided_slice %17 {offsets = [0, 5, 0], sizes = [2, 1, 4], strides = [1, 1, 1]} : vector<2x8x4xf32> to vector<2x1x4xf32>
    %251 = vector.shape_cast %250 : vector<2x1x4xf32> to vector<2x4xf32>
    %252 = vector.extract_strided_slice %251 {offsets = [0, 0], sizes = [2, 1], strides = [1, 1]} : vector<2x4xf32> to vector<2x1xf32>
    %253 = vector.extract_strided_slice %1 {offsets = [0, 0], sizes = [1, 128], strides = [1, 1]} : vector<4x128xf32> to vector<1x128xf32>
    %254 = vector.broadcast %252 : vector<2x1xf32> to vector<2x128xf32>
    %255 = vector.broadcast %253 : vector<1x128xf32> to vector<2x128xf32>
    %256 = arith.mulf %254, %255 : vector<2x128xf32>
    %257 = arith.addf %4, %256 : vector<2x128xf32>
    %258 = vector.extract_strided_slice %251 {offsets = [0, 1], sizes = [2, 1], strides = [1, 1]} : vector<2x4xf32> to vector<2x1xf32>
    %259 = vector.extract_strided_slice %1 {offsets = [1, 0], sizes = [1, 128], strides = [1, 1]} : vector<4x128xf32> to vector<1x128xf32>
    %260 = vector.broadcast %258 : vector<2x1xf32> to vector<2x128xf32>
    %261 = vector.broadcast %259 : vector<1x128xf32> to vector<2x128xf32>
    %262 = arith.mulf %260, %261 : vector<2x128xf32>
    %263 = arith.addf %257, %262 : vector<2x128xf32>
    %264 = vector.extract_strided_slice %251 {offsets = [0, 2], sizes = [2, 1], strides = [1, 1]} : vector<2x4xf32> to vector<2x1xf32>
    %265 = vector.extract_strided_slice %1 {offsets = [2, 0], sizes = [1, 128], strides = [1, 1]} : vector<4x128xf32> to vector<1x128xf32>
    %266 = vector.broadcast %264 : vector<2x1xf32> to vector<2x128xf32>
    %267 = vector.broadcast %265 : vector<1x128xf32> to vector<2x128xf32>
    %268 = arith.mulf %266, %267 : vector<2x128xf32>
    %269 = arith.addf %263, %268 : vector<2x128xf32>
    %270 = vector.extract_strided_slice %251 {offsets = [0, 3], sizes = [2, 1], strides = [1, 1]} : vector<2x4xf32> to vector<2x1xf32>
    %271 = vector.extract_strided_slice %1 {offsets = [3, 0], sizes = [1, 128], strides = [1, 1]} : vector<4x128xf32> to vector<1x128xf32>
    %272 = vector.broadcast %270 : vector<2x1xf32> to vector<2x128xf32>
    %273 = vector.broadcast %271 : vector<1x128xf32> to vector<2x128xf32>
    %274 = arith.mulf %272, %273 : vector<2x128xf32>
    %275 = arith.addf %269, %274 : vector<2x128xf32>
    %cst_18 = arith.constant dense<0.000000e+00> : vector<2x128xf32>
    %276 = tpu.matmul %249, %0, %cst_18 {dimension_numbers = #tpu.dot_dimension_numbers<[1], [0], [0], [1], [0, 0, 1, 1], [], []>} : vector<2x128xf32>, vector<128x128xf32>, vector<2x128xf32> -> vector<2x128xf32>
    %277 = arith.addf %275, %276 : vector<2x128xf32>
    %278 = arith.mulf %277, %13 : vector<2x128xf32>
    %279 = math.tanh %278 : vector<2x128xf32>
    %280 = arith.mulf %279, %13 : vector<2x128xf32>
    %281 = arith.addf %280, %16 : vector<2x128xf32>
    %282 = vector.extract_strided_slice %281 {offsets = [0, 96], sizes = [2, 32], strides = [1, 1]} : vector<2x128xf32> to vector<2x32xf32>
    %283 = vector.extract_strided_slice %281 {offsets = [0, 0], sizes = [2, 96], strides = [1, 1]} : vector<2x128xf32> to vector<2x96xf32>
    %284 = tpu.concatenate %282, %283 in 1 : vector<2x32xf32>, vector<2x96xf32> -> vector<2x128xf32>
    %285 = vector.extract_strided_slice %281 {offsets = [0, 32], sizes = [2, 96], strides = [1, 1]} : vector<2x128xf32> to vector<2x96xf32>
    %286 = vector.extract_strided_slice %281 {offsets = [0, 0], sizes = [2, 32], strides = [1, 1]} : vector<2x128xf32> to vector<2x32xf32>
    %287 = tpu.concatenate %285, %286 in 1 : vector<2x96xf32>, vector<2x32xf32> -> vector<2x128xf32>
    %288 = arith.mulf %284, %287 : vector<2x128xf32>
    %289 = vector.extract_strided_slice %281 {offsets = [0, 64], sizes = [2, 64], strides = [1, 1]} : vector<2x128xf32> to vector<2x64xf32>
    %290 = vector.extract_strided_slice %281 {offsets = [0, 0], sizes = [2, 64], strides = [1, 1]} : vector<2x128xf32> to vector<2x64xf32>
    %291 = tpu.concatenate %289, %290 in 1 : vector<2x64xf32>, vector<2x64xf32> -> vector<2x128xf32>
    %292 = arith.mulf %281, %247 : vector<2x128xf32>
    %293 = arith.addf %292, %288 : vector<2x128xf32>
    %294 = math.tanh %293 : vector<2x128xf32>
    %295 = arith.mulf %291, %294 : vector<2x128xf32>
    %296 = vector.extract_strided_slice %17 {offsets = [0, 6, 0], sizes = [2, 1, 4], strides = [1, 1, 1]} : vector<2x8x4xf32> to vector<2x1x4xf32>
    %297 = vector.shape_cast %296 : vector<2x1x4xf32> to vector<2x4xf32>
    %298 = vector.extract_strided_slice %297 {offsets = [0, 0], sizes = [2, 1], strides = [1, 1]} : vector<2x4xf32> to vector<2x1xf32>
    %299 = vector.extract_strided_slice %1 {offsets = [0, 0], sizes = [1, 128], strides = [1, 1]} : vector<4x128xf32> to vector<1x128xf32>
    %300 = vector.broadcast %298 : vector<2x1xf32> to vector<2x128xf32>
    %301 = vector.broadcast %299 : vector<1x128xf32> to vector<2x128xf32>
    %302 = arith.mulf %300, %301 : vector<2x128xf32>
    %303 = arith.addf %4, %302 : vector<2x128xf32>
    %304 = vector.extract_strided_slice %297 {offsets = [0, 1], sizes = [2, 1], strides = [1, 1]} : vector<2x4xf32> to vector<2x1xf32>
    %305 = vector.extract_strided_slice %1 {offsets = [1, 0], sizes = [1, 128], strides = [1, 1]} : vector<4x128xf32> to vector<1x128xf32>
    %306 = vector.broadcast %304 : vector<2x1xf32> to vector<2x128xf32>
    %307 = vector.broadcast %305 : vector<1x128xf32> to vector<2x128xf32>
    %308 = arith.mulf %306, %307 : vector<2x128xf32>
    %309 = arith.addf %303, %308 : vector<2x128xf32>
    %310 = vector.extract_strided_slice %297 {offsets = [0, 2], sizes = [2, 1], strides = [1, 1]} : vector<2x4xf32> to vector<2x1xf32>
    %311 = vector.extract_strided_slice %1 {offsets = [2, 0], sizes = [1, 128], strides = [1, 1]} : vector<4x128xf32> to vector<1x128xf32>
    %312 = vector.broadcast %310 : vector<2x1xf32> to vector<2x128xf32>
    %313 = vector.broadcast %311 : vector<1x128xf32> to vector<2x128xf32>
    %314 = arith.mulf %312, %313 : vector<2x128xf32>
    %315 = arith.addf %309, %314 : vector<2x128xf32>
    %316 = vector.extract_strided_slice %297 {offsets = [0, 3], sizes = [2, 1], strides = [1, 1]} : vector<2x4xf32> to vector<2x1xf32>
    %317 = vector.extract_strided_slice %1 {offsets = [3, 0], sizes = [1, 128], strides = [1, 1]} : vector<4x128xf32> to vector<1x128xf32>
    %318 = vector.broadcast %316 : vector<2x1xf32> to vector<2x128xf32>
    %319 = vector.broadcast %317 : vector<1x128xf32> to vector<2x128xf32>
    %320 = arith.mulf %318, %319 : vector<2x128xf32>
    %321 = arith.addf %315, %320 : vector<2x128xf32>
    %cst_19 = arith.constant dense<0.000000e+00> : vector<2x128xf32>
    %322 = tpu.matmul %295, %0, %cst_19 {dimension_numbers = #tpu.dot_dimension_numbers<[1], [0], [0], [1], [0, 0, 1, 1], [], []>} : vector<2x128xf32>, vector<128x128xf32>, vector<2x128xf32> -> vector<2x128xf32>
    %323 = arith.addf %321, %322 : vector<2x128xf32>
    %324 = arith.mulf %323, %13 : vector<2x128xf32>
    %325 = math.tanh %324 : vector<2x128xf32>
    %326 = arith.mulf %325, %13 : vector<2x128xf32>
    %327 = arith.addf %326, %16 : vector<2x128xf32>
    %328 = vector.extract_strided_slice %327 {offsets = [0, 96], sizes = [2, 32], strides = [1, 1]} : vector<2x128xf32> to vector<2x32xf32>
    %329 = vector.extract_strided_slice %327 {offsets = [0, 0], sizes = [2, 96], strides = [1, 1]} : vector<2x128xf32> to vector<2x96xf32>
    %330 = tpu.concatenate %328, %329 in 1 : vector<2x32xf32>, vector<2x96xf32> -> vector<2x128xf32>
    %331 = vector.extract_strided_slice %327 {offsets = [0, 32], sizes = [2, 96], strides = [1, 1]} : vector<2x128xf32> to vector<2x96xf32>
    %332 = vector.extract_strided_slice %327 {offsets = [0, 0], sizes = [2, 32], strides = [1, 1]} : vector<2x128xf32> to vector<2x32xf32>
    %333 = tpu.concatenate %331, %332 in 1 : vector<2x96xf32>, vector<2x32xf32> -> vector<2x128xf32>
    %334 = arith.mulf %330, %333 : vector<2x128xf32>
    %335 = vector.extract_strided_slice %327 {offsets = [0, 64], sizes = [2, 64], strides = [1, 1]} : vector<2x128xf32> to vector<2x64xf32>
    %336 = vector.extract_strided_slice %327 {offsets = [0, 0], sizes = [2, 64], strides = [1, 1]} : vector<2x128xf32> to vector<2x64xf32>
    %337 = tpu.concatenate %335, %336 in 1 : vector<2x64xf32>, vector<2x64xf32> -> vector<2x128xf32>
    %338 = arith.mulf %327, %293 : vector<2x128xf32>
    %339 = arith.addf %338, %334 : vector<2x128xf32>
    %340 = math.tanh %339 : vector<2x128xf32>
    %341 = arith.mulf %337, %340 : vector<2x128xf32>
    %342 = vector.extract_strided_slice %17 {offsets = [0, 7, 0], sizes = [2, 1, 4], strides = [1, 1, 1]} : vector<2x8x4xf32> to vector<2x1x4xf32>
    %343 = vector.shape_cast %342 : vector<2x1x4xf32> to vector<2x4xf32>
    %344 = vector.extract_strided_slice %343 {offsets = [0, 0], sizes = [2, 1], strides = [1, 1]} : vector<2x4xf32> to vector<2x1xf32>
    %345 = vector.extract_strided_slice %1 {offsets = [0, 0], sizes = [1, 128], strides = [1, 1]} : vector<4x128xf32> to vector<1x128xf32>
    %346 = vector.broadcast %344 : vector<2x1xf32> to vector<2x128xf32>
    %347 = vector.broadcast %345 : vector<1x128xf32> to vector<2x128xf32>
    %348 = arith.mulf %346, %347 : vector<2x128xf32>
    %349 = arith.addf %4, %348 : vector<2x128xf32>
    %350 = vector.extract_strided_slice %343 {offsets = [0, 1], sizes = [2, 1], strides = [1, 1]} : vector<2x4xf32> to vector<2x1xf32>
    %351 = vector.extract_strided_slice %1 {offsets = [1, 0], sizes = [1, 128], strides = [1, 1]} : vector<4x128xf32> to vector<1x128xf32>
    %352 = vector.broadcast %350 : vector<2x1xf32> to vector<2x128xf32>
    %353 = vector.broadcast %351 : vector<1x128xf32> to vector<2x128xf32>
    %354 = arith.mulf %352, %353 : vector<2x128xf32>
    %355 = arith.addf %349, %354 : vector<2x128xf32>
    %356 = vector.extract_strided_slice %343 {offsets = [0, 2], sizes = [2, 1], strides = [1, 1]} : vector<2x4xf32> to vector<2x1xf32>
    %357 = vector.extract_strided_slice %1 {offsets = [2, 0], sizes = [1, 128], strides = [1, 1]} : vector<4x128xf32> to vector<1x128xf32>
    %358 = vector.broadcast %356 : vector<2x1xf32> to vector<2x128xf32>
    %359 = vector.broadcast %357 : vector<1x128xf32> to vector<2x128xf32>
    %360 = arith.mulf %358, %359 : vector<2x128xf32>
    %361 = arith.addf %355, %360 : vector<2x128xf32>
    %362 = vector.extract_strided_slice %343 {offsets = [0, 3], sizes = [2, 1], strides = [1, 1]} : vector<2x4xf32> to vector<2x1xf32>
    %363 = vector.extract_strided_slice %1 {offsets = [3, 0], sizes = [1, 128], strides = [1, 1]} : vector<4x128xf32> to vector<1x128xf32>
    %364 = vector.broadcast %362 : vector<2x1xf32> to vector<2x128xf32>
    %365 = vector.broadcast %363 : vector<1x128xf32> to vector<2x128xf32>
    %366 = arith.mulf %364, %365 : vector<2x128xf32>
    %367 = arith.addf %361, %366 : vector<2x128xf32>
    %cst_20 = arith.constant dense<0.000000e+00> : vector<2x128xf32>
    %368 = tpu.matmul %341, %0, %cst_20 {dimension_numbers = #tpu.dot_dimension_numbers<[1], [0], [0], [1], [0, 0, 1, 1], [], []>} : vector<2x128xf32>, vector<128x128xf32>, vector<2x128xf32> -> vector<2x128xf32>
    %369 = arith.addf %367, %368 : vector<2x128xf32>
    %370 = arith.mulf %369, %13 : vector<2x128xf32>
    %371 = math.tanh %370 : vector<2x128xf32>
    %372 = arith.mulf %371, %13 : vector<2x128xf32>
    %373 = arith.addf %372, %16 : vector<2x128xf32>
    %374 = vector.extract_strided_slice %373 {offsets = [0, 96], sizes = [2, 32], strides = [1, 1]} : vector<2x128xf32> to vector<2x32xf32>
    %375 = vector.extract_strided_slice %373 {offsets = [0, 0], sizes = [2, 96], strides = [1, 1]} : vector<2x128xf32> to vector<2x96xf32>
    %376 = tpu.concatenate %374, %375 in 1 : vector<2x32xf32>, vector<2x96xf32> -> vector<2x128xf32>
    %377 = vector.extract_strided_slice %373 {offsets = [0, 32], sizes = [2, 96], strides = [1, 1]} : vector<2x128xf32> to vector<2x96xf32>
    %378 = vector.extract_strided_slice %373 {offsets = [0, 0], sizes = [2, 32], strides = [1, 1]} : vector<2x128xf32> to vector<2x32xf32>
    %379 = tpu.concatenate %377, %378 in 1 : vector<2x96xf32>, vector<2x32xf32> -> vector<2x128xf32>
    %380 = arith.mulf %376, %379 : vector<2x128xf32>
    %381 = vector.extract_strided_slice %373 {offsets = [0, 64], sizes = [2, 64], strides = [1, 1]} : vector<2x128xf32> to vector<2x64xf32>
    %382 = vector.extract_strided_slice %373 {offsets = [0, 0], sizes = [2, 64], strides = [1, 1]} : vector<2x128xf32> to vector<2x64xf32>
    %383 = tpu.concatenate %381, %382 in 1 : vector<2x64xf32>, vector<2x64xf32> -> vector<2x128xf32>
    %384 = arith.mulf %373, %339 : vector<2x128xf32>
    %385 = arith.addf %384, %380 : vector<2x128xf32>
    %386 = math.tanh %385 : vector<2x128xf32>
    %387 = arith.mulf %383, %386 : vector<2x128xf32>
    %c0_21 = arith.constant 0 : index
    %c0_22 = arith.constant 0 : index
    %388 = vector.load %arg4[%c0_21, %c0_22] : memref<1x128xf32, #tpu.memory_space<vmem>>, vector<1x128xf32>
    %389 = vector.broadcast %388 : vector<1x128xf32> to vector<2x128xf32>
    %390 = arith.mulf %387, %389 : vector<2x128xf32>
    %cst_23 = arith.constant dense<0.000000e+00> : vector<2xf32>
    %391 = vector.multi_reduction <add>, %390, %cst_23 [1] : vector<2x128xf32> to vector<2xf32>
    %392 = vector.shape_cast %391 : vector<2xf32> to vector<2x1xf32>
    %c0_24 = arith.constant 0 : index
    %c0_25 = arith.constant 0 : index
    %393 = vector.load %arg5[%c0_24, %c0_25] : memref<1x1xf32, #tpu.memory_space<vmem>>, vector<1x1xf32>
    %394 = vector.broadcast %393 : vector<1x1xf32> to vector<2x1xf32>
    %395 = arith.addf %392, %394 : vector<2x1xf32>
    %c0_26 = arith.constant 0 : index
    %c0_27 = arith.constant 0 : index
    %396 = vector.load %arg6[%c0_26, %c0_27] : memref<2x1xf32, #tpu.memory_space<vmem>>, vector<2x1xf32>
    tpu.vector_store %arg6[%c0_26, %c0_27], %395 {strides = array<i32>} : memref<2x1xf32, #tpu.memory_space<vmem>>, vector<2x1xf32>,
    return
  }
}

</mosaic_0001>

<bundles_post_ra>
// kernel: tpu_custom_call.1
= control target key start
LH: loop header
LB: loop body
LE: loop exit
PB: predicated region body
PF: predicated region fallthrough
CT: control target
= control target key end

     0   :  { %s2104_s0 = inlined_call_operand.vmem [shape: f32[2,8,4], index: 0, kind: input, shape index: {}]   ;;  %s2105_s1 = inlined_call_operand.vmem [shape: f32[4,128], index: 1, kind: input, shape index: {}]   ;;  %s2106_s2 = inlined_call_operand.vmem [shape: f32[1,128], index: 2, kind: input, shape index: {}]   ;;  %s2107_s3 = inlined_call_operand.hbm [shape: f32[128,128], index: 3, kind: input, shape index: {}]   ;;  %s2108_s4 = inlined_call_operand.vmem [shape: f32[1,128], index: 4, kind: input, shape index: {}]   ;;  %s2109_s5 = inlined_call_operand.<no memory space> [shape: f32[1,1], index: 5, kind: input, shape index: {}]   ;;  %s2110_s6 = inlined_call_operand.vmem [shape: f32[2,1], index: 6, kind: output, shape index: {}]  }
   0x1   :  { %v11_v0 = vstv %s2109_s5 }
   0x2   :  { %12 = vst [vmem:[#allocation2] sm:$0x1] %v11_v0 }
   0x3   :  { %13 = vsyncpa [#allocation4], 0  ;;  %s1536_s23 = smov [#allocation3]  }
   0x4   :  { %s25_s24 = sshll.u32 %s1536_s23, 4  ;;  %s26_s24 = int_to_ptr.vmem [resolvable:$true] %s25_s24 }
   0x5   :  { %s1522_s25 = scalar_lea.vmem %s26_s24, 2048  ;;  %p1527_p1 = scmp.lt.s32.totalorder %s26_s24, %s26_s24 }
   0x6   :  { %p1523_p0 = scmp.ne.s32.totalorder %s26_s24, %s1522_s25  ;;  %p1528_p2 = scmp.lt.s32.totalorder %s1522_s25, %s1522_s25 }
   0x8   :  { %p1529_p3 = por %p1528_p2, %p1527_p1 }
   0xa   :  { %p1530_p4 = pnand %p1529_p3, %p1523_p0 }
   0xc   :  { %1533 = shalt.err (!%p1530_p4)
}
   0xd   :  { %s1537_s26 = smov 128   ;;  %s1538_s27 = smov 8  }
   0xe   :  { %31 = dma.hbm_to_vmem [thread:$0]  %s2107_s3, 2048, %s26_s24, [#allocation4], %s1537_s26, %s1537_s26, %s1538_s27  }
   0xf   :  { %1534 = dma.done.wait [#allocation4], 2048  }
  0x10   :  { %1535 = vsyncadd [#allocation4], 4294965248  ;;  %v1539_v1 = vmov 0.0   ;;  %vm1540_vm0 = vmmov 0   ;;  %v1541_v2 = vmov 1   ;;  %v1542_v3 = vmov 0  }
  0x11   :  { %1177 = vmatprep.subr.mxu0 %v1539_v1  ;;  %1209 = vmatprep.mubr.msk.f32.mxu0 %vm1540_vm0, %v1539_v1  ;;  %v1596_v4 = vld [vmem:[#allocation3 + $0x78] sm:$0xff]  ;;  %v1598_v5 = vld [vmem:[#allocation3 + $0x70] sm:$0xff]  ;;  %v1603_v6 = vld [vmem:[#allocation3 + $0x68] sm:$0xff]  ;;  %v1543_v15 = vmov 2   ;;  %v1544_v19 = vmov 3   ;;  %v63_v24 = vlaneseq  ;;  %vm91_vm1 = vcmask 1041409  }
  0x12   :  { %1471 = vset.pattern.permute.xlu1 %v1541_v2  ;;  %1470 = vset.pattern.permute.xlu0 %v1542_v3  ;;  %v1609_v7 = vld [vmem:[#allocation3 + $0x60] sm:$0xff]  ;;  %v1618_v9 = vld [vmem:[#allocation3 + $0x58] sm:$0xff]  ;;  %v1625_v11 = vld [vmem:[#allocation3 + $0x50] sm:$0xff]  ;;  %s1547_s10 = smov 32   ;;  %s1548_s11 = smov 96   ;;  %vm1019_vm5 = vcmask 1041408  }
  0x13   :  { %1212 = vmatprep.subr.mxu1 %v1539_v1  ;;  %1244 = vmatprep.mubr.msk.f32.mxu1 %vm1540_vm0, %v1539_v1  ;;  %v71_v8 = vld [vmem:[%s2104_s0 + $0x8] sm:$0xff]  ;;  %v70_v10 = vld [vmem:[%s2104_s0] sm:$0xff]  ;;  %v1645_v16 = vld [vmem:[#allocation3 + $0x30] sm:$0xff]  ;;  %v83_v25 = vshrl.u32 %v63_v24, 7  ;;  %vm1031_vm6 = vcmask 1024  }
  0x14   :  { %1178 = vmatpush3.msra.mxu0 %v1596_v4  ;;  %1213 = vmatpush3.msra.mxu1 %v1596_v4  ;;  %v1631_v12 = vld [vmem:[#allocation3 + $0x48] sm:$0xff]  ;;  %v1635_v13 = vld [vmem:[#allocation3 + $0x40] sm:$0xff]  ;;  %v1641_v14 = vld [vmem:[#allocation3 + $0x38] sm:$0xff] }
  0x15   :  { %1179 = vmatprep.subr.mxu0 %v1539_v1  ;;  %1214 = vmatprep.subr.mxu1 %v1539_v1  ;;  %v1649_v17 = vld [vmem:[#allocation3 + $0x28] sm:$0xff]  ;;  %v1655_v18 = vld [vmem:[#allocation3 + $0x20] sm:$0xff]  ;;  %v1659_v20 = vld [vmem:[#allocation3 + $0x18] sm:$0xff]  ;;  %v105_v26 = vsub.s32 1, %v83_v25  ;;  %v84_v27 = vsub.s32 0, %v83_v25  ;;  %v125_v33 = vsub.s32 2, %v83_v25 }
  0x16   :  { %1180 = vmatpush3.msra.mxu0 %v1598_v5  ;;  %1215 = vmatpush3.msra.mxu1 %v1598_v5  ;;  %v1663_v21 = vld [vmem:[#allocation3 + $0x10] sm:$0xff]  ;;  %v1669_v22 = vld [vmem:[#allocation3 + $0x8] sm:$0xff]  ;;  %v1675_v23 = vld [vmem:[#allocation3] sm:$0xff]  ;;  %v145_v39 = vsub.s32 3, %v83_v25 }
  0x17   :  { %1181 = vmatprep.subr.mxu0 %v1539_v1  ;;  %1216 = vmatprep.subr.mxu1 %v1539_v1  ;;  %v55_v28 = vld [vmem:[%s2105_s1] sm:$0xf] }
  0x18   :  { %1182 = vmatpush3.msra.mxu0 %v1603_v6  ;;  %1217 = vmatpush3.msra.mxu1 %v1603_v6  ;;  %v106_v29 = vrot.slane %v55_v28, %v105_v26  ;;  %v85_v31 = vrot.slane %v55_v28, %v84_v27  ;;  %v126_v43 = vrot.slane %v55_v28, %v125_v33  ;;  %v1755_v49 = vld [vmem:[%s2106_s2] ss:$0 sm:$0xff]  ;;  %s1546_s2 = smov 64  }
  0x19   :  { %1183 = vmatprep.subr.mxu0 %v1539_v1  ;;  %100 = vperm.xlu1 %1471, %v71_v8   ;;  %v146_v54 = vrot.slane %v55_v28, %v145_v39 }
  0x1a   :  { %1184 = vmatpush3.msra.mxu0 %v1609_v7  ;;  %79 = vperm.xlu0 %1470, %v71_v8  }
  0x1b   :  { %1185 = vmatprep.subr.mxu0 %v1539_v1  ;;  %1218 = vmatprep.subr.mxu1 %v1539_v1 }
  0x1c   :  { %1186 = vmatpush3.msra.mxu0 %v1618_v9  ;;  %1219 = vmatpush3.msra.mxu1 %v1609_v7 }
  0x1d   :  { %1187 = vmatprep.subr.mxu0 %v1539_v1  ;;  %96 = vperm.xlu1 %1471, %v70_v10  }
  0x1e   :  { %1188 = vmatpush3.msra.mxu0 %v1625_v11  ;;  %74 = vperm.xlu0 %1470, %v70_v10  }
  0x1f   :  { %1189 = vmatprep.subr.mxu0 %v1539_v1  ;;  %1220 = vmatprep.subr.mxu1 %v1539_v1 }
  0x20   :  { %1190 = vmatpush3.msra.mxu0 %v1631_v12  ;;  %1221 = vmatpush3.msra.mxu1 %v1618_v9 }
  0x21   :  { %1191 = vmatprep.subr.mxu0 %v1539_v1  ;;  %1473 = vset.pattern.permute.xlu1 %v1543_v15 }
  0x22   :  { %1192 = vmatpush3.msra.mxu0 %v1635_v13  ;;  %1472 = vset.pattern.permute.xlu0 %v1543_v15 }
  0x23   :  { %1193 = vmatprep.subr.mxu0 %v1539_v1  ;;  %116 = vperm.xlu1 %1473, %v70_v10  }
  0x24   :  { %1194 = vmatpush3.msra.mxu0 %v1641_v14  ;;  %120 = vperm.xlu0 %1472, %v71_v8  }
  0x25   :  { %1195 = vmatprep.subr.mxu0 %v1539_v1  ;;  %1222 = vmatprep.subr.mxu1 %v1539_v1 }
  0x26   :  { %1196 = vmatpush3.msra.mxu0 %v1645_v16  ;;  %1223 = vmatpush3.msra.mxu1 %v1625_v11 }
  0x27   :  { %1197 = vmatprep.subr.mxu0 %v1539_v1  ;;  %1474 = vset.pattern.permute.xlu1 %v1544_v19 }
  0x28   :  { %1198 = vmatpush3.msra.mxu0 %v1649_v17  ;;  %1475 = vset.pattern.permute.xlu0 %v1544_v19 }
  0x29   :  { %1199 = vmatprep.subr.mxu0 %v1539_v1  ;;  %140 = vperm.xlu1 %1474, %v71_v8  }
  0x2a   :  { %1200 = vmatpush3.msra.mxu0 %v1655_v18  ;;  %136 = vperm.xlu0 %1475, %v70_v10  }
  0x2b   :  { %1201 = vmatprep.subr.mxu0 %v1539_v1  ;;  %1224 = vmatprep.subr.mxu1 %v1539_v1 }
  0x2c   :  { %1202 = vmatpush3.msra.mxu0 %v1659_v20  ;;  %1225 = vmatpush3.msra.mxu1 %v1631_v12 }
  0x2d   :  { %1203 = vmatprep.subr.mxu0 %v1539_v1  ;;  %1226 = vmatprep.subr.mxu1 %v1539_v1 }
  0x2e   :  { %1204 = vmatpush3.msra.mxu0 %v1663_v21  ;;  %1227 = vmatpush3.msra.mxu1 %v1635_v13 }
  0x2f   :  { %1205 = vmatprep.subr.mxu0 %v1539_v1  ;;  %1228 = vmatprep.subr.mxu1 %v1539_v1 }
  0x30   :  { %1206 = vmatpush3.msra.mxu0 %v1669_v22  ;;  %1229 = vmatpush3.msra.mxu1 %v1641_v14 }
  0x31   :  { %1207 = vmatprep.subr.mxu0 %v1539_v1  ;;  %1230 = vmatprep.subr.mxu1 %v1539_v1 }
  0x32   :  { %1208 = vmatpush3.msra.mxu0 %v1675_v23  ;;  %1231 = vmatpush3.msra.mxu1 %v1645_v16 }
  0x33   :  { %1210 = vmatmul.mubr.f32.vlgmr.msra.gmra.mxu0 %v1539_v1  ;;  %1232 = vmatprep.subr.mxu1 %v1539_v1 }
  0x34   :  { %1233 = vmatpush3.msra.mxu1 %v1649_v17  ;;  %1247 = vmatprep.subr.mxu0 %v1539_v1 }
  0x35   :  { %1234 = vmatprep.subr.mxu1 %v1539_v1  ;;  %1248 = vmatpush3.msra.mxu0 %v1596_v4 }
  0x36   :  { %1235 = vmatpush3.msra.mxu1 %v1655_v18  ;;  %1249 = vmatprep.subr.mxu0 %v1539_v1 }
  0x37   :  { %1236 = vmatprep.subr.mxu1 %v1539_v1  ;;  %1250 = vmatpush3.msra.mxu0 %v1598_v5 }
  0x38   :  { %1237 = vmatpush3.msra.mxu1 %v1659_v20  ;;  %1251 = vmatprep.subr.mxu0 %v1539_v1 }
  0x39   :  { %1238 = vmatprep.subr.mxu1 %v1539_v1  ;;  %1252 = vmatpush3.msra.mxu0 %v1603_v6 }
  0x3a   :  { %1239 = vmatpush3.msra.mxu1 %v1663_v21  ;;  %1253 = vmatprep.subr.mxu0 %v1539_v1 }
  0x3b   :  { %1240 = vmatprep.subr.mxu1 %v1539_v1  ;;  %1254 = vmatpush3.msra.mxu0 %v1609_v7 }
  0x3c   :  { %1241 = vmatpush3.msra.mxu1 %v1669_v22  ;;  %1255 = vmatprep.subr.mxu0 %v1539_v1 }
  0x3d   :  { %1242 = vmatprep.subr.mxu1 %v1539_v1  ;;  %1256 = vmatpush3.msra.mxu0 %v1618_v9 }
  0x3e   :  { %1243 = vmatpush3.msra.mxu1 %v1675_v23  ;;  %1257 = vmatprep.subr.mxu0 %v1539_v1 }
  0x3f   :  { %1258 = vmatpush3.msra.mxu0 %v1625_v11  ;;  %1279 = vmatprep.mubr.msk.f32.mxu0 %vm1540_vm0, %v1539_v1 }
  0x40   :  { %1259 = vmatprep.subr.mxu0 %v1539_v1  ;;  %1282 = vmatprep.subr.mxu1 %v1539_v1 }
  0x41   :  { %1260 = vmatpush3.msra.mxu0 %v1631_v12 }
  0x42   :  { %1261 = vmatprep.subr.mxu0 %v1539_v1 }
  0x43   :  { %1262 = vmatpush3.msra.mxu0 %v1635_v13 }
  0x44   :  { %1263 = vmatprep.subr.mxu0 %v1539_v1 }
  0x45   :  { %1264 = vmatpush3.msra.mxu0 %v1641_v14 }
  0x46   :  { %1265 = vmatprep.subr.mxu0 %v1539_v1 }
  0x47   :  { %1266 = vmatpush3.msra.mxu0 %v1645_v16 }
  0x48   :  { %1267 = vmatprep.subr.mxu0 %v1539_v1 }
  0x49   :  { %1268 = vmatpush3.msra.mxu0 %v1649_v17 }
  0x4a   :  { %1269 = vmatprep.subr.mxu0 %v1539_v1 }
  0x4b   :  { %1270 = vmatpush3.msra.mxu0 %v1655_v18 }
  0x4c   :  { %1271 = vmatprep.subr.mxu0 %v1539_v1 }
  0x4d   :  { %1272 = vmatpush3.msra.mxu0 %v1659_v20 }
  0x4e   :  { %1273 = vmatprep.subr.mxu0 %v1539_v1 }
  0x4f   :  { %1274 = vmatpush3.msra.mxu0 %v1663_v21 }
  0x50   :  { %1275 = vmatprep.subr.mxu0 %v1539_v1 }
  0x51   :  { %1276 = vmatpush3.msra.mxu0 %v1669_v22 }
  0x52   :  { %1277 = vmatprep.subr.mxu0 %v1539_v1 }
  0x53   :  { %1278 = vmatpush3.msra.mxu0 %v1675_v23 }
  0x54   :  { %1317 = vmatprep.subr.mxu0 %v1539_v1 }
  0x94   :  { %v101_v30 = vpop.permute.xlu1 %100 }
  0x95   :  { %v80_v32 = vpop.permute.xlu0 %79  ;;  %v1737_v34 = vmul.f32 %v106_v29, %v101_v30 }
  0x96   :  { %v1739_v35 = vmul.f32 %v85_v31, %v80_v32 }
  0x97   :  { %v357_v40 = vrot.slane %v1737_v34, 1  ;;  %v467_v41 = vrot.slane %v1737_v34, 2  ;;  %v577_v8 = vrot.slane %v1737_v34, 3 }
  0x98   :  { %v97_v36 = vpop.permute.xlu1 %96  ;;  %v352_v44 = vrot.slane %v1739_v35, 1  ;;  %v462_v45 = vrot.slane %v1739_v35, 2  ;;  %v572_v53 = vrot.slane %v1739_v35, 3  ;;  %v682_v33 = vrot.slane %v1739_v35, 4 }
  0x99   :  { %v1741_v37 = vmul.f32 %v106_v29, %v97_v36  ;;  %v75_v38 = vpop.permute.xlu0 %74 }
  0x9a   :  { %v1745_v42 = vmul.f32 %v85_v31, %v75_v38 }
  0x9b   :  { %v249_v46 = vrot.slane %v1741_v37, 1  ;;  %v356_v47 = vrot.slane %v1741_v37, 2  ;;  %v466_v48 = vrot.slane %v1741_v37, 3  ;;  %v576_v25 = vrot.slane %v1741_v37, 4 }
  0x9c   :  { %v245_v50 = vrot.slane %v1745_v42, 1  ;;  %v351_v51 = vrot.slane %v1745_v42, 2  ;;  %v461_v52 = vrot.slane %v1745_v42, 3  ;;  %v571_v62 = vrot.slane %v1745_v42, 4 }
  0x9d   :  { %v250_v55 = vsel %vm91_vm1, %v1737_v34, %v249_v46  ;;  %v358_v56 = vsel %vm91_vm1, %v357_v40, %v356_v47  ;;  %v468_v57 = vsel %vm91_vm1, %v467_v41, %v466_v48  ;;  %v578_v40 = vsel %vm91_vm1, %v577_v8, %v576_v25 }
  0x9e   :  { %v117_v58 = vpop.permute.xlu1 %116  ;;  %v246_v59 = vsel %vm91_vm1, %v1739_v35, %v245_v50  ;;  %v353_v60 = vsel %vm91_vm1, %v352_v44, %v351_v51  ;;  %v463_v61 = vsel %vm91_vm1, %v462_v45, %v461_v52  ;;  %v573_v19 = vsel %vm91_vm1, %v572_v53, %v571_v62 }
  0x9f   :  { %v1770_v63 = vmul.f32 %v126_v43, %v117_v58  ;;  %v121_v0 = vpop.permute.xlu0 %120  ;;  %v248_v2 = vadd.f32 %v1755_v49, %v246_v59  ;;  %v355_v3 = vadd.f32 %v1755_v49, %v353_v60  ;;  %v465_v15 = vadd.f32 %v1755_v49, %v463_v61 }
  0xa0   :  { %v1775_v10 = vmul.f32 %v126_v43, %v121_v0  ;;  %v575_v39 = vadd.f32 %v1755_v49, %v573_v19  ;;  %v687_v46 = vrot.slane %v1737_v34, 4  ;;  %v792_v52 = vrot.slane %v1739_v35, 5 }
  0xa1   :  { %v252_v26 = vadd.f32 %v250_v55, %v248_v2  ;;  %v253_v27 = vrot.slane %v1770_v63, 1  ;;  %v360_v28 = vadd.f32 %v358_v56, %v355_v3  ;;  %v361_v29 = vrot.slane %v1770_v63, 2 }
  0xa2   :  { %v362_v30 = vrot.slane %v1775_v10, 1  ;;  %v470_v31 = vadd.f32 %v468_v57, %v465_v15  ;;  %v471_v32 = vrot.slane %v1770_v63, 3  ;;  %v472_v38 = vrot.slane %v1775_v10, 2 }
  0xa3   :  { %v254_v36 = vsel %vm91_vm1, %v1775_v10, %v253_v27  ;;  %v581_v45 = vrot.slane %v1770_v63, 4  ;;  %v580_v56 = vadd.f32 %v578_v40, %v575_v39  ;;  %v582_v57 = vrot.slane %v1775_v10, 3 }
  0xa4   :  { %v141_v41 = vpop.permute.xlu1 %140  ;;  %v256_v43 = vadd.f32 %v254_v36, %v252_v26  ;;  %v363_v44 = vsel %vm91_vm1, %v362_v30, %v361_v29  ;;  %v473_v51 = vsel %vm91_vm1, %v472_v38, %v471_v32  ;;  %v797_v61 = vrot.slane %v1737_v34, 5 }
  0xa5   :  { %v1793_v47 = vmul.f32 %v146_v54, %v141_v41  ;;  %v137_v48 = vpop.permute.xlu0 %136  ;;  %v365_v50 = vadd.f32 %v363_v44, %v360_v28  ;;  %v475_v55 = vadd.f32 %v473_v51, %v470_v31  ;;  %v681_v15 = vrot.slane %v1745_v42, 5 }
  0xa6   :  { %v1797_v53 = vmul.f32 %v146_v54, %v137_v48  ;;  %v583_v54 = vsel %vm91_vm1, %v582_v57, %v581_v45  ;;  %v902_v19 = vrot.slane %v1739_v35, 6  ;;  %v907_v28 = vrot.slane %v1737_v34, 6 }
  0xa7   :  { %v367_v58 = vrot.slane %v1793_v47, 1  ;;  %v477_v59 = vrot.slane %v1793_v47, 2  ;;  %v587_v60 = vrot.slane %v1793_v47, 3  ;;  %v585_v3 = vadd.f32 %v583_v54, %v580_v56 }
  0xa8   :  { %v257_v62 = vrot.slane %v1797_v53, 1  ;;  %v366_v0 = vrot.slane %v1797_v53, 2  ;;  %v476_v2 = vrot.slane %v1797_v53, 3  ;;  %v586_v8 = vrot.slane %v1797_v53, 4 }
  0xa9   :  { %v683_v38 = vsel %vm91_vm1, %v682_v33, %v681_v15  ;;  %v686_v39 = vrot.slane %v1741_v37, 5  ;;  %v691_v40 = vrot.slane %v1770_v63, 5  ;;  %v692_v44 = vrot.slane %v1775_v10, 4 }
  0xaa   :  { %v258_v25 = vsel %vm91_vm1, %v1793_v47, %v257_v62  ;;  %v368_v26 = vsel %vm91_vm1, %v367_v58, %v366_v0  ;;  %v478_v27 = vsel %vm91_vm1, %v477_v59, %v476_v2  ;;  %v588_v32 = vsel %vm91_vm1, %v587_v60, %v586_v8 }
  0xab   :  { %v1816_v29 = vadd.f32 %v258_v25, %v256_v43  ;;  %v1818_v30 = vadd.f32 %v368_v26, %v365_v50  ;;  %v1820_v31 = vadd.f32 %v478_v27, %v475_v55  ;;  %v1823_v36 = vadd.f32 %v588_v32, %v585_v3 }
  0xac   :  { %v685_v41 = vadd.f32 %v1755_v49, %v683_v38  ;;  %v696_v43 = vrot.slane %v1797_v53, 5  ;;  %v697_v45 = vrot.slane %v1793_v47, 4  ;;  %v688_v48 = vsel %vm91_vm1, %v687_v46, %v686_v39 }
  0xad   :  { %v791_v50 = vrot.slane %v1745_v42, 6  ;;  %v796_v51 = vrot.slane %v1741_v37, 6  ;;  %v801_v33 = vrot.slane %v1770_v63, 6  ;;  %v693_v56 = vsel %vm91_vm1, %v692_v44, %v691_v40 }
  0xae   :  { %v690_v55 = vadd.f32 %v688_v48, %v685_v41  ;;  %v698_v57 = vsel %vm91_vm1, %v697_v45, %v696_v43  ;;  %v802_v58 = vrot.slane %v1775_v10, 5  ;;  %v806_v62 = vrot.slane %v1797_v53, 6 }
  0xaf   :  { %v793_v59 = vsel %vm91_vm1, %v792_v52, %v791_v50  ;;  %v798_v60 = vsel %vm91_vm1, %v797_v61, %v796_v51  ;;  %v807_v46 = vrot.slane %v1793_v47, 5  ;;  %v901_v3 = vrot.slane %v1745_v42, 7 }
  0xb0   :  { %v695_v0 = vadd.f32 %v693_v56, %v690_v55  ;;  %v795_v2 = vadd.f32 %v1755_v49, %v793_v59  ;;  %v803_v54 = vsel %vm91_vm1, %v802_v58, %v801_v33  ;;  %v906_v15 = vrot.slane %v1741_v37, 7 }
  0xb1   :  { %v808_v8 = vsel %vm91_vm1, %v807_v46, %v806_v62  ;;  %v911_v25 = vrot.slane %v1770_v63, 7  ;;  %v912_v52 = vrot.slane %v1775_v10, 6  ;;  %v903_v27 = vsel %vm91_vm1, %v902_v19, %v901_v3 }
  0xb2   :  { %v1850_v61 = vadd.f32 %v698_v57, %v695_v0  ;;  %v800_v26 = vadd.f32 %v798_v60, %v795_v2  ;;  %v916_v32 = vrot.slane %v1797_v53, 7  ;;  %v905_v38 = vadd.f32 %v1755_v49, %v903_v27 }
  0xb3   :  { %v908_v39 = vsel %vm91_vm1, %v907_v28, %v906_v15  ;;  %v913_v40 = vsel %vm91_vm1, %v912_v52, %v911_v25  ;;  %v917_v41 = vrot.slane %v1793_v47, 6  ;;  %v90_v19 = vrot.slane %v1739_v35, 7 }
  0xb4   :  { %v805_v44 = vadd.f32 %v803_v54, %v800_v26  ;;  %v910_v43 = vadd.f32 %v908_v39, %v905_v38  ;;  %v111_v28 = vrot.slane %v1737_v34, 7  ;;  %v131_v57 = vrot.slane %v1775_v10, 7 }
  0xb5   :  { %v918_v45 = vsel %vm91_vm1, %v917_v41, %v916_v32  ;;  %v92_v33 = vsel %vm91_vm1, %v90_v19, %v1745_v42  ;;  %v64_v58 = vand.u32 127, %v63_v24  ;;  %v151_v35 = vrot.slane %v1793_v47, 7 }
  0xb6   :  { %v1859_v48 = vadd.f32 %v808_v8, %v805_v44  ;;  %v915_v50 = vadd.f32 %v913_v40, %v910_v43  ;;  %v94_v55 = vadd.f32 %v1755_v49, %v92_v33  ;;  %v112_v56 = vsel %vm91_vm1, %v111_v28, %v1741_v37 }
  0xb7   :  { %v132_v60 = vsel %vm91_vm1, %v131_v57, %v1770_v63  ;;  %vm65_vm2 = vcmp.ge.s32.totalorder %v64_v58, 64  ;;  %vm66_vm3 = vcmp.lt.s32.totalorder %v64_v58, 96  ;;  %v152_v34 = vsel %vm91_vm1, %v151_v35, %v1797_v53 }
  0xb8   :  { %v1861_v51 = vadd.f32 %v918_v45, %v915_v50  ;;  %v114_v59 = vadd.f32 %v112_v56, %v94_v55  ;;  %vm67_vm4 = vmand %vm65_vm2, %vm66_vm3  ;;  %v1545_v62 = vmov 0.5  }
  0xb9   :  { %v1877_v37 = vsel %vm67_vm4, 1.0, %v1545_v62  ;;  %v1880_v2 = vsel %vm67_vm4, 0.0, %v1545_v62 }
  0xba   :  { %v134_v42 = vadd.f32 %v132_v60, %v114_v59 }
  0xbc   :  { %v154_v49 = vadd.f32 %v152_v34, %v134_v42 }
  0xf3   :  { %v221_v10 = vpop.f32.mrf.mxu0 }
  0xf4   :  { %v225_v46 = vadd.f32 %v221_v10, %v154_v49 }
  0xf5   :  { %v1211_v24 = vpop.f32.mrf.mxu0 }
  0xf6   :  { %v226_v0 = vmul.f32 %v225_v46, %v1877_v37 }
  0xf8   :  { %1476 = vtanh.f32 %v226_v0 }
 0x105   :  { %v1477_v63 = vpop.eup %1476 }
 0x106   :  { %v228_v47 = vmul.f32 %v1477_v63, %v1877_v37 }
 0x108   :  { %v229_v54 = vadd.f32 %v228_v47, %v1880_v2 }
 0x10a   :  { %238 = vrot.lane.b32.xlu0 %v229_v54, %s1546_s2  ;;  %231 = vrot.lane.b32.xlu1 %v229_v54, %s1547_s10  ;;  %v241_v15 = vmul.f32 0.0, %v229_v54 }
 0x10e   :  { %234 = vrot.lane.b32.xlu1 %v229_v54, %s1548_s11 }
 0x17c   :  { %v232_v53 = vpop.permute.xlu1 %231  ;;  %v239_v26 = vpop.permute.xlu0 %238 }
 0x180   :  { %v235_v3 = vpop.permute.xlu1 %234 }
 0x181   :  { %v237_v8 = vmul.f32 %v235_v3, %v232_v53 }
 0x183   :  { %v242_v25 = vadd.f32 %v241_v15, %v237_v8 }
 0x185   :  { %1478 = vtanh.f32 %v242_v25 }
 0x192   :  { %v1479_v52 = vpop.eup %1478 }
 0x193   :  { %v244_v27 = vmul.f32 %v1479_v52, %v239_v26 }
 0x195   :  { %1245 = vmatmul.mubr.f32.vlgmr.msra.gmra.mxu1 %v244_v27 }
 0x196   :  { %1283 = vmatpush3.msra.mxu1 %v1596_v4  ;;  %1314 = vmatprep.mubr.msk.f32.mxu1 %vm1540_vm0, %v1539_v1 }
 0x197   :  { %1284 = vmatprep.subr.mxu1 %v1539_v1 }
 0x198   :  { %1285 = vmatpush3.msra.mxu1 %v1598_v5 }
 0x199   :  { %1286 = vmatprep.subr.mxu1 %v1539_v1 }
 0x19a   :  { %1287 = vmatpush3.msra.mxu1 %v1603_v6 }
 0x19b   :  { %1288 = vmatprep.subr.mxu1 %v1539_v1 }
 0x19c   :  { %1289 = vmatpush3.msra.mxu1 %v1609_v7 }
 0x19d   :  { %1290 = vmatprep.subr.mxu1 %v1539_v1 }
 0x19e   :  { %1291 = vmatpush3.msra.mxu1 %v1618_v9 }
 0x19f   :  { %1292 = vmatprep.subr.mxu1 %v1539_v1 }
 0x1a0   :  { %1293 = vmatpush3.msra.mxu1 %v1625_v11 }
 0x1a1   :  { %1294 = vmatprep.subr.mxu1 %v1539_v1 }
 0x1a2   :  { %1295 = vmatpush3.msra.mxu1 %v1631_v12 }
 0x1a3   :  { %1296 = vmatprep.subr.mxu1 %v1539_v1 }
 0x1a4   :  { %1297 = vmatpush3.msra.mxu1 %v1635_v13 }
 0x1a5   :  { %1298 = vmatprep.subr.mxu1 %v1539_v1 }
 0x1a6   :  { %1299 = vmatpush3.msra.mxu1 %v1641_v14 }
 0x1a7   :  { %1300 = vmatprep.subr.mxu1 %v1539_v1 }
 0x1a8   :  { %1301 = vmatpush3.msra.mxu1 %v1645_v16 }
 0x1a9   :  { %1302 = vmatprep.subr.mxu1 %v1539_v1 }
 0x1aa   :  { %1303 = vmatpush3.msra.mxu1 %v1649_v17 }
 0x1ab   :  { %1304 = vmatprep.subr.mxu1 %v1539_v1 }
 0x1ac   :  { %1305 = vmatpush3.msra.mxu1 %v1655_v18 }
 0x1ad   :  { %1306 = vmatprep.subr.mxu1 %v1539_v1 }
 0x1ae   :  { %1307 = vmatpush3.msra.mxu1 %v1659_v20 }
 0x1af   :  { %1308 = vmatprep.subr.mxu1 %v1539_v1 }
 0x1b0   :  { %1309 = vmatpush3.msra.mxu1 %v1663_v21 }
 0x1b1   :  { %1310 = vmatprep.subr.mxu1 %v1539_v1 }
 0x1b2   :  { %1311 = vmatpush3.msra.mxu1 %v1669_v22 }
 0x1b3   :  { %1312 = vmatprep.subr.mxu1 %v1539_v1 }
 0x1b4   :  { %1313 = vmatpush3.msra.mxu1 %v1675_v23 }
 0x1b5   :  { %1352 = vmatprep.subr.mxu1 %v1539_v1 }
 0x255   :  { %v327_v32 = vpop.f32.mrf.mxu1 }
 0x256   :  { %v331_v38 = vadd.f32 %v327_v32, %v1816_v29 }
 0x257   :  { %v1246_v39 = vpop.f32.mrf.mxu1 }
 0x258   :  { %v332_v40 = vmul.f32 %v331_v38, %v1877_v37 }
 0x25a   :  { %1480 = vtanh.f32 %v332_v40 }
 0x267   :  { %v1481_v41 = vpop.eup %1480 }
 0x268   :  { %v334_v44 = vmul.f32 %v1481_v41, %v1877_v37 }
 0x26a   :  { %v335_v43 = vadd.f32 %v334_v44, %v1880_v2 }
 0x26c   :  { %340 = vrot.lane.b32.xlu0 %v335_v43, %s1548_s11  ;;  %337 = vrot.lane.b32.xlu1 %v335_v43, %s1547_s10  ;;  %v347_v33 = vmul.f32 %v335_v43, %v242_v25 }
 0x270   :  { %344 = vrot.lane.b32.xlu1 %v335_v43, %s1546_s2 }
 0x2de   :  { %v341_v45 = vpop.permute.xlu0 %340  ;;  %v338_v50 = vpop.permute.xlu1 %337 }
 0x2df   :  { %v343_v19 = vmul.f32 %v341_v45, %v338_v50 }
 0x2e1   :  { %v348_v29 = vadd.f32 %v347_v33, %v343_v19 }
 0x2e2   :  { %v345_v55 = vpop.permute.xlu1 %344 }
 0x2e3   :  { %1482 = vtanh.f32 %v348_v29 }
 0x2f0   :  { %v1483_v28 = vpop.eup %1482 }
 0x2f1   :  { %v350_v56 = vmul.f32 %v1483_v28, %v345_v55  ;;  %v1508_v28 = vld [vmem:[#allocation3 + $0x78] sm:$0xff]  ;;  %v1509_v55 = vld [vmem:[#allocation3 + $0x70] sm:$0xff] }
 0x2f3   :  { %1280 = vmatmul.mubr.f32.vlgmr.msra.gmra.mxu0 %v350_v56  ;;  %v1510_v56 = vld [vmem:[#allocation3 + $0x68] sm:$0xff] }
 0x2f4   :  { %1318 = vmatpush3.msra.mxu0 %v1596_v4  ;;  %1349 = vmatprep.mubr.msk.f32.mxu0 %vm1540_vm0, %v1539_v1 }
 0x2f5   :  { %1319 = vmatprep.subr.mxu0 %v1539_v1 }
 0x2f6   :  { %1320 = vmatpush3.msra.mxu0 %v1598_v5 }
 0x2f7   :  { %1321 = vmatprep.subr.mxu0 %v1539_v1 }
 0x2f8   :  { %1322 = vmatpush3.msra.mxu0 %v1603_v6 }
 0x2f9   :  { %1323 = vmatprep.subr.mxu0 %v1539_v1 }
 0x2fa   :  { %1324 = vmatpush3.msra.mxu0 %v1609_v7 }
 0x2fb   :  { %1325 = vmatprep.subr.mxu0 %v1539_v1 }
 0x2fc   :  { %1326 = vmatpush3.msra.mxu0 %v1618_v9 }
 0x2fd   :  { %1327 = vmatprep.subr.mxu0 %v1539_v1 }
 0x2fe   :  { %1328 = vmatpush3.msra.mxu0 %v1625_v11 }
 0x2ff   :  { %1329 = vmatprep.subr.mxu0 %v1539_v1 }
 0x300   :  { %1330 = vmatpush3.msra.mxu0 %v1631_v12 }
 0x301   :  { %1331 = vmatprep.subr.mxu0 %v1539_v1 }
 0x302   :  { %1332 = vmatpush3.msra.mxu0 %v1635_v13 }
 0x303   :  { %1333 = vmatprep.subr.mxu0 %v1539_v1 }
 0x304   :  { %1334 = vmatpush3.msra.mxu0 %v1641_v14 }
 0x305   :  { %1335 = vmatprep.subr.mxu0 %v1539_v1 }
 0x306   :  { %1336 = vmatpush3.msra.mxu0 %v1645_v16 }
 0x307   :  { %1337 = vmatprep.subr.mxu0 %v1539_v1 }
 0x308   :  { %1338 = vmatpush3.msra.mxu0 %v1649_v17 }
 0x309   :  { %1339 = vmatprep.subr.mxu0 %v1539_v1 }
 0x30a   :  { %1340 = vmatpush3.msra.mxu0 %v1655_v18 }
 0x30b   :  { %1341 = vmatprep.subr.mxu0 %v1539_v1 }
 0x30c   :  { %1342 = vmatpush3.msra.mxu0 %v1659_v20 }
 0x30d   :  { %1343 = vmatprep.subr.mxu0 %v1539_v1 }
 0x30e   :  { %1344 = vmatpush3.msra.mxu0 %v1663_v21 }
 0x30f   :  { %1345 = vmatprep.subr.mxu0 %v1539_v1 }
 0x310   :  { %1346 = vmatpush3.msra.mxu0 %v1669_v22 }
 0x311   :  { %1347 = vmatprep.subr.mxu0 %v1539_v1 }
 0x312   :  { %1348 = vmatpush3.msra.mxu0 %v1675_v23 }
 0x313   :  { %1387 = vmatprep.subr.mxu0 %v1539_v1 }
 0x3b3   :  { %v437_v57 = vpop.f32.mrf.mxu0 }
 0x3b4   :  { %v441_v58 = vadd.f32 %v437_v57, %v1818_v30  ;;  %v1511_v57 = vld [vmem:[#allocation3 + $0x60] sm:$0xff] }
 0x3b5   :  { %v1281_v59 = vpop.f32.mrf.mxu0 }
 0x3b6   :  { %v442_v60 = vmul.f32 %v441_v58, %v1877_v37  ;;  %v1512_v58 = vld [vmem:[#allocation3 + $0x58] sm:$0xff]  ;;  %v1513_v59 = vld [vmem:[#allocation3 + $0x50] sm:$0xff] }
 0x3b8   :  { %1484 = vtanh.f32 %v442_v60 }
 0x3c5   :  { %v1485_v35 = vpop.eup %1484 }
 0x3c6   :  { %v444_v42 = vmul.f32 %v1485_v35, %v1877_v37 }
 0x3c8   :  { %v445_v34 = vadd.f32 %v444_v42, %v1880_v2 }
 0x3ca   :  { %450 = vrot.lane.b32.xlu1 %v445_v34, %s1548_s11  ;;  %447 = vrot.lane.b32.xlu0 %v445_v34, %s1547_s10  ;;  %v457_v46 = vmul.f32 %v445_v34, %v348_v29 }
 0x3ce   :  { %454 = vrot.lane.b32.xlu0 %v445_v34, %s1546_s2 }
 0x43c   :  { %v451_v49 = vpop.permute.xlu1 %450  ;;  %v448_v62 = vpop.permute.xlu0 %447 }
 0x43d   :  { %v453_v10 = vmul.f32 %v451_v49, %v448_v62 }
 0x43f   :  { %v458_v30 = vadd.f32 %v457_v46, %v453_v10 }
 0x440   :  { %v455_v0 = vpop.permute.xlu0 %454 }
 0x441   :  { %1486 = vtanh.f32 %v458_v30 }
 0x44e   :  { %v1487_v24 = vpop.eup %1486 }
 0x44f   :  { %v460_v63 = vmul.f32 %v1487_v24, %v455_v0 }
 0x451   :  { %1315 = vmatmul.mubr.f32.vlgmr.msra.gmra.mxu1 %v460_v63 }
 0x452   :  { %1353 = vmatpush3.msra.mxu1 %v1596_v4  ;;  %1384 = vmatprep.mubr.msk.f32.mxu1 %vm1540_vm0, %v1539_v1 }
 0x453   :  { %1354 = vmatprep.subr.mxu1 %v1539_v1 }
 0x454   :  { %1355 = vmatpush3.msra.mxu1 %v1598_v5 }
 0x455   :  { %1356 = vmatprep.subr.mxu1 %v1539_v1 }
 0x456   :  { %1357 = vmatpush3.msra.mxu1 %v1603_v6 }
 0x457   :  { %1358 = vmatprep.subr.mxu1 %v1539_v1 }
 0x458   :  { %1359 = vmatpush3.msra.mxu1 %v1609_v7 }
 0x459   :  { %1360 = vmatprep.subr.mxu1 %v1539_v1 }
 0x45a   :  { %1361 = vmatpush3.msra.mxu1 %v1618_v9 }
 0x45b   :  { %1362 = vmatprep.subr.mxu1 %v1539_v1 }
 0x45c   :  { %1363 = vmatpush3.msra.mxu1 %v1625_v11 }
 0x45d   :  { %1364 = vmatprep.subr.mxu1 %v1539_v1 }
 0x45e   :  { %1365 = vmatpush3.msra.mxu1 %v1631_v12 }
 0x45f   :  { %1366 = vmatprep.subr.mxu1 %v1539_v1 }
 0x460   :  { %1367 = vmatpush3.msra.mxu1 %v1635_v13 }
 0x461   :  { %1368 = vmatprep.subr.mxu1 %v1539_v1 }
 0x462   :  { %1369 = vmatpush3.msra.mxu1 %v1641_v14 }
 0x463   :  { %1370 = vmatprep.subr.mxu1 %v1539_v1 }
 0x464   :  { %1371 = vmatpush3.msra.mxu1 %v1645_v16 }
 0x465   :  { %1372 = vmatprep.subr.mxu1 %v1539_v1 }
 0x466   :  { %1373 = vmatpush3.msra.mxu1 %v1649_v17 }
 0x467   :  { %1374 = vmatprep.subr.mxu1 %v1539_v1 }
 0x468   :  { %1375 = vmatpush3.msra.mxu1 %v1655_v18 }
 0x469   :  { %1376 = vmatprep.subr.mxu1 %v1539_v1 }
 0x46a   :  { %1377 = vmatpush3.msra.mxu1 %v1659_v20 }
 0x46b   :  { %1378 = vmatprep.subr.mxu1 %v1539_v1 }
 0x46c   :  { %1379 = vmatpush3.msra.mxu1 %v1663_v21 }
 0x46d   :  { %1380 = vmatprep.subr.mxu1 %v1539_v1 }
 0x46e   :  { %1381 = vmatpush3.msra.mxu1 %v1669_v22 }
 0x46f   :  { %1382 = vmatprep.subr.mxu1 %v1539_v1 }
 0x470   :  { %1383 = vmatpush3.msra.mxu1 %v1675_v23 }
 0x471   :  { %1422 = vmatprep.subr.mxu1 %v1539_v1 }
 0x511   :  { %v547_v47 = vpop.f32.mrf.mxu1 }
 0x512   :  { %v551_v54 = vadd.f32 %v547_v47, %v1820_v31 }
 0x513   :  { %v1316_v53 = vpop.f32.mrf.mxu1 }
 0x514   :  { %v552_v3 = vmul.f32 %v551_v54, %v1877_v37 }
 0x516   :  { %1488 = vtanh.f32 %v552_v3 }
 0x523   :  { %v1489_v8 = vpop.eup %1488 }
 0x524   :  { %v554_v15 = vmul.f32 %v1489_v8, %v1877_v37 }
 0x526   :  { %v555_v25 = vadd.f32 %v554_v15, %v1880_v2 }
 0x528   :  { %560 = vrot.lane.b32.xlu0 %v555_v25, %s1548_s11  ;;  %557 = vrot.lane.b32.xlu1 %v555_v25, %s1547_s10  ;;  %v567_v32 = vmul.f32 %v555_v25, %v458_v30 }
 0x52c   :  { %564 = vrot.lane.b32.xlu1 %v555_v25, %s1546_s2 }
 0x59a   :  { %v561_v52 = vpop.permute.xlu0 %560  ;;  %v558_v26 = vpop.permute.xlu1 %557 }
 0x59b   :  { %v563_v27 = vmul.f32 %v561_v52, %v558_v26 }
 0x59d   :  { %v568_v31 = vadd.f32 %v567_v32, %v563_v27 }
 0x59e   :  { %v565_v39 = vpop.permute.xlu1 %564 }
 0x59f   :  { %1490 = vtanh.f32 %v568_v31 }
 0x5ac   :  { %v1491_v38 = vpop.eup %1490 }
 0x5ad   :  { %v570_v40 = vmul.f32 %v1491_v38, %v565_v39 }
 0x5af   :  { %1350 = vmatmul.mubr.f32.vlgmr.msra.gmra.mxu0 %v570_v40 }
 0x5b0   :  { %1388 = vmatpush3.msra.mxu0 %v1596_v4  ;;  %1419 = vmatprep.mubr.msk.f32.mxu0 %vm1540_vm0, %v1539_v1 }
 0x5b1   :  { %1389 = vmatprep.subr.mxu0 %v1539_v1 }
 0x5b2   :  { %1390 = vmatpush3.msra.mxu0 %v1598_v5 }
 0x5b3   :  { %1391 = vmatprep.subr.mxu0 %v1539_v1 }
 0x5b4   :  { %1392 = vmatpush3.msra.mxu0 %v1603_v6 }
 0x5b5   :  { %1393 = vmatprep.subr.mxu0 %v1539_v1 }
 0x5b6   :  { %1394 = vmatpush3.msra.mxu0 %v1609_v7 }
 0x5b7   :  { %1395 = vmatprep.subr.mxu0 %v1539_v1 }
 0x5b8   :  { %1396 = vmatpush3.msra.mxu0 %v1618_v9 }
 0x5b9   :  { %1397 = vmatprep.subr.mxu0 %v1539_v1 }
 0x5ba   :  { %1398 = vmatpush3.msra.mxu0 %v1625_v11 }
 0x5bb   :  { %1399 = vmatprep.subr.mxu0 %v1539_v1 }
 0x5bc   :  { %1400 = vmatpush3.msra.mxu0 %v1631_v12 }
 0x5bd   :  { %1401 = vmatprep.subr.mxu0 %v1539_v1 }
 0x5be   :  { %1402 = vmatpush3.msra.mxu0 %v1635_v13 }
 0x5bf   :  { %1403 = vmatprep.subr.mxu0 %v1539_v1 }
 0x5c0   :  { %1404 = vmatpush3.msra.mxu0 %v1641_v14 }
 0x5c1   :  { %1405 = vmatprep.subr.mxu0 %v1539_v1 }
 0x5c2   :  { %1406 = vmatpush3.msra.mxu0 %v1645_v16 }
 0x5c3   :  { %1407 = vmatprep.subr.mxu0 %v1539_v1 }
 0x5c4   :  { %1408 = vmatpush3.msra.mxu0 %v1649_v17 }
 0x5c5   :  { %1409 = vmatprep.subr.mxu0 %v1539_v1 }
 0x5c6   :  { %1410 = vmatpush3.msra.mxu0 %v1655_v18 }
 0x5c7   :  { %1411 = vmatprep.subr.mxu0 %v1539_v1 }
 0x5c8   :  { %1412 = vmatpush3.msra.mxu0 %v1659_v20 }
 0x5c9   :  { %1413 = vmatprep.subr.mxu0 %v1539_v1 }
 0x5ca   :  { %1414 = vmatpush3.msra.mxu0 %v1663_v21 }
 0x5cb   :  { %1415 = vmatprep.subr.mxu0 %v1539_v1 }
 0x5cc   :  { %1416 = vmatpush3.msra.mxu0 %v1669_v22 }
 0x5cd   :  { %1417 = vmatprep.subr.mxu0 %v1539_v1 }
 0x5ce   :  { %1418 = vmatpush3.msra.mxu0 %v1675_v23 }
 0x66f   :  { %v657_v4 = vpop.f32.mrf.mxu0 }
 0x670   :  { %v661_v5 = vadd.f32 %v657_v4, %v1823_v36 }
 0x671   :  { %v1351_v6 = vpop.f32.mrf.mxu0 }
 0x672   :  { %v662_v7 = vmul.f32 %v661_v5, %v1877_v37 }
 0x674   :  { %1492 = vtanh.f32 %v662_v7 }
 0x681   :  { %v1493_v9 = vpop.eup %1492 }
 0x682   :  { %v664_v11 = vmul.f32 %v1493_v9, %v1877_v37 }
 0x684   :  { %v665_v41 = vadd.f32 %v664_v11, %v1880_v2  ;;  %v1040_v11 = vld [vmem:[#allocation2] ss:$0 sm:$0xff] }
 0x686   :  { %670 = vrot.lane.b32.xlu1 %v665_v41, %s1548_s11  ;;  %667 = vrot.lane.b32.xlu0 %v665_v41, %s1547_s10  ;;  %v677_v50 = vmul.f32 %v665_v41, %v568_v31 }
 0x68a   :  { %674 = vrot.lane.b32.xlu0 %v665_v41, %s1546_s2 }
 0x6f8   :  { %v671_v44 = vpop.permute.xlu1 %670  ;;  %v668_v43 = vpop.permute.xlu0 %667 }
 0x6f9   :  { %v673_v45 = vmul.f32 %v671_v44, %v668_v43 }
 0x6fb   :  { %v678_v36 = vadd.f32 %v677_v50, %v673_v45 }
 0x6fc   :  { %v675_v33 = vpop.permute.xlu0 %674 }
 0x6fd   :  { %1494 = vtanh.f32 %v678_v36 }
 0x70a   :  { %v1495_v19 = vpop.eup %1494 }
 0x70b   :  { %v680_v29 = vmul.f32 %v1495_v19, %v675_v33 }
 0x70d   :  { %1385 = vmatmul.mubr.f32.vlgmr.msra.gmra.mxu1 %v680_v29 }
 0x70e   :  { %1423 = vmatpush3.msra.mxu1 %v1508_v28  ;;  %1454 = vmatprep.mubr.msk.f32.mxu1 %vm1540_vm0, %v1539_v1 }
 0x70f   :  { %1424 = vmatprep.subr.mxu1 %v1539_v1 }
 0x710   :  { %1425 = vmatpush3.msra.mxu1 %v1509_v55 }
 0x711   :  { %1426 = vmatprep.subr.mxu1 %v1539_v1 }
 0x712   :  { %1427 = vmatpush3.msra.mxu1 %v1510_v56 }
 0x713   :  { %1428 = vmatprep.subr.mxu1 %v1539_v1 }
 0x714   :  { %1429 = vmatpush3.msra.mxu1 %v1511_v57 }
 0x715   :  { %1430 = vmatprep.subr.mxu1 %v1539_v1 }
 0x716   :  { %1431 = vmatpush3.msra.mxu1 %v1512_v58 }
 0x717   :  { %1432 = vmatprep.subr.mxu1 %v1539_v1 }
 0x718   :  { %1433 = vmatpush3.msra.mxu1 %v1513_v59 }
 0x719   :  { %1434 = vmatprep.subr.mxu1 %v1539_v1 }
 0x71a   :  { %1435 = vmatpush3.msra.mxu1 %v1631_v12 }
 0x71b   :  { %1436 = vmatprep.subr.mxu1 %v1539_v1 }
 0x71c   :  { %1437 = vmatpush3.msra.mxu1 %v1635_v13 }
 0x71d   :  { %1438 = vmatprep.subr.mxu1 %v1539_v1 }
 0x71e   :  { %1439 = vmatpush3.msra.mxu1 %v1641_v14 }
 0x71f   :  { %1440 = vmatprep.subr.mxu1 %v1539_v1 }
 0x720   :  { %1441 = vmatpush3.msra.mxu1 %v1645_v16 }
 0x721   :  { %1442 = vmatprep.subr.mxu1 %v1539_v1 }
 0x722   :  { %1443 = vmatpush3.msra.mxu1 %v1649_v17 }
 0x723   :  { %1444 = vmatprep.subr.mxu1 %v1539_v1 }
 0x724   :  { %1445 = vmatpush3.msra.mxu1 %v1655_v18 }
 0x725   :  { %1446 = vmatprep.subr.mxu1 %v1539_v1 }
 0x726   :  { %1447 = vmatpush3.msra.mxu1 %v1659_v20 }
 0x727   :  { %1448 = vmatprep.subr.mxu1 %v1539_v1 }
 0x728   :  { %1449 = vmatpush3.msra.mxu1 %v1663_v21 }
 0x729   :  { %1450 = vmatprep.subr.mxu1 %v1539_v1 }
 0x72a   :  { %1451 = vmatpush3.msra.mxu1 %v1669_v22 }
 0x72b   :  { %1452 = vmatprep.subr.mxu1 %v1539_v1 }
 0x72c   :  { %1453 = vmatpush3.msra.mxu1 %v1675_v23 }
 0x7cd   :  { %v767_v12 = vpop.f32.mrf.mxu1 }
 0x7ce   :  { %v771_v13 = vadd.f32 %v767_v12, %v1850_v61 }
 0x7cf   :  { %v1386_v14 = vpop.f32.mrf.mxu1 }
 0x7d0   :  { %v772_v16 = vmul.f32 %v771_v13, %v1877_v37 }
 0x7d2   :  { %1496 = vtanh.f32 %v772_v16 }
 0x7df   :  { %v1497_v17 = vpop.eup %1496 }
 0x7e0   :  { %v774_v18 = vmul.f32 %v1497_v17, %v1877_v37 }
 0x7e2   :  { %v775_v20 = vadd.f32 %v774_v18, %v1880_v2 }
 0x7e4   :  { %780 = vrot.lane.b32.xlu0 %v775_v20, %s1548_s11  ;;  %777 = vrot.lane.b32.xlu1 %v775_v20, %s1547_s10  ;;  %v787_v23 = vmul.f32 %v775_v20, %v678_v36 }
 0x7e8   :  { %784 = vrot.lane.b32.xlu1 %v775_v20, %s1546_s2 }
 0x856   :  { %v781_v1 = vpop.permute.xlu0 %780  ;;  %v778_v21 = vpop.permute.xlu1 %777 }
 0x857   :  { %v783_v22 = vmul.f32 %v781_v1, %v778_v21 }
 0x859   :  { %v788_v61 = vadd.f32 %v787_v23, %v783_v22 }
 0x85a   :  { %v785_v35 = vpop.permute.xlu1 %784 }
 0x85b   :  { %1498 = vtanh.f32 %v788_v61 }
 0x868   :  { %v1499_v60 = vpop.eup %1498 }
 0x869   :  { %v790_v42 = vmul.f32 %v1499_v60, %v785_v35 }
 0x86b   :  { %1420 = vmatmul.mubr.f32.vlgmr.msra.gmra.mxu0 %v790_v42 }
 0x92b   :  { %v877_v34 = vpop.f32.mrf.mxu0 }
 0x92c   :  { %v881_v49 = vadd.f32 %v877_v34, %v1859_v48 }
 0x92d   :  { %v1421_v62 = vpop.f32.mrf.mxu0 }
 0x92e   :  { %v882_v10 = vmul.f32 %v881_v49, %v1877_v37 }
 0x930   :  { %1500 = vtanh.f32 %v882_v10 }
 0x93d   :  { %v1501_v46 = vpop.eup %1500 }
 0x93e   :  { %v884_v30 = vmul.f32 %v1501_v46, %v1877_v37 }
 0x940   :  { %v885_v24 = vadd.f32 %v884_v30, %v1880_v2 }
 0x942   :  { %890 = vrot.lane.b32.xlu1 %v885_v24, %s1548_s11  ;;  %887 = vrot.lane.b32.xlu0 %v885_v24, %s1547_s10  ;;  %v897_v54 = vmul.f32 %v885_v24, %v788_v61 }
 0x946   :  { %894 = vrot.lane.b32.xlu0 %v885_v24, %s1546_s2 }
 0x9b4   :  { %v891_v0 = vpop.permute.xlu1 %890  ;;  %v888_v63 = vpop.permute.xlu0 %887 }
 0x9b5   :  { %v893_v47 = vmul.f32 %v891_v0, %v888_v63 }
 0x9b7   :  { %v898_v48 = vadd.f32 %v897_v54, %v893_v47 }
 0x9b8   :  { %v895_v3 = vpop.permute.xlu0 %894 }
 0x9b9   :  { %1502 = vtanh.f32 %v898_v48 }
 0x9c6   :  { %v1503_v53 = vpop.eup %1502 }
 0x9c7   :  { %v900_v8 = vmul.f32 %v1503_v53, %v895_v3 }
 0x9c9   :  { %1455 = vmatmul.mubr.f32.vlgmr.msra.gmra.mxu1 %v900_v8 }
 0xa89   :  { %v987_v15 = vpop.f32.mrf.mxu1 }
 0xa8a   :  { %v991_v25 = vadd.f32 %v987_v15, %v1861_v51 }
 0xa8b   :  { %v1456_v52 = vpop.f32.mrf.mxu1 }
 0xa8c   :  { %v992_v26 = vmul.f32 %v991_v25, %v1877_v37 }
 0xa8e   :  { %1504 = vtanh.f32 %v992_v26 }
 0xa9b   :  { %v1505_v27 = vpop.eup %1504 }
 0xa9c   :  { %v994_v32 = vmul.f32 %v1505_v27, %v1877_v37  ;;  %v1039_v37 = vld [vmem:[%s2108_s4] ss:$0 sm:$0xff] }
 0xa9e   :  { %v995_v31 = vadd.f32 %v994_v32, %v1880_v2 }
 0xaa0   :  { %1000 = vrot.lane.b32.xlu0 %v995_v31, %s1548_s11  ;;  %997 = vrot.lane.b32.xlu1 %v995_v31, %s1547_s10  ;;  %v1007_v4 = vmul.f32 %v995_v31, %v898_v48 }
 0xaa4   :  { %1004 = vrot.lane.b32.xlu1 %v995_v31, %s1546_s2 }
 0xb12   :  { %v1001_v38 = vpop.permute.xlu0 %1000  ;;  %v998_v39 = vpop.permute.xlu1 %997 }
 0xb13   :  { %v1003_v40 = vmul.f32 %v1001_v38, %v998_v39 }
 0xb15   :  { %v1008_v51 = vadd.f32 %v1007_v4, %v1003_v40 }
 0xb16   :  { %v1005_v6 = vpop.permute.xlu1 %1004 }
 0xb17   :  { %1506 = vtanh.f32 %v1008_v51 }
 0xb24   :  { %v1507_v5 = vpop.eup %1506 }
 0xb25   :  { %v1010_v7 = vmul.f32 %v1507_v5, %v1005_v6 }
 0xb27   :  { %v1018_v2 = vmul.f32 %v1039_v37, %v1010_v7 }
 0xb29   :  { %v1020_v9 = vsel %vm1019_vm5, %v1018_v2, 0.0 }
 0xb2a   :  { %1021 = vadd.xlane.f32.xlu0 %v1020_v9 }
 0xbb3   :  { %v1022_v41 = vpop.xlane.xlu0 %1021 }
 0xbb4   :  { %v1030_v44 = vadd.f32 %v1040_v11, %v1022_v41 }
 0xbb6   :  { %1032 = vst.msk [vmem:[%s2110_s6] sm:$0x3] %vm1031_vm6, %v1030_v44 }
 0xbb7   :  { %1037 = vsyncpa [#allocation4], 1 }

</bundles_post_ra>
